<compile_context>
chip_gen: v7x
topology: tpu7x:2x2x1
jax: 0.10.0
libtpu: 0.0.40
codegen_flags: <defaults>
</compile_context>

<pallas_src>
import functools

import jax
import jax.numpy as jnp
from jax.experimental import pallas as pl
from jax.experimental.pallas import tpu as pltpu


# ----------------------------------------------------------------------------
# Pallas kernel: one LSTM layer, both directions fused in one pallas_call.
# grid = (2,) over direction (0 = forward, 1 = backward), "parallel" semantics
# so v7x megacore can run the two independent recurrences concurrently.
# Gate order follows PyTorch: [i, f, g, o].
# ----------------------------------------------------------------------------
def _bilstm_layer_kernel(x_ref, wih_ref, whh_ref, b_ref, out_ref, gx_scr):
    d = pl.program_id(0)                      # 0 = forward, 1 = backward
    T, B, I = x_ref.shape
    H = out_ref.shape[-1]

    # ---- hoisted input projection (outside the serial recurrence) ----------
    # One big (T*B, I) @ (I, 4H) matmul that actually fills the MXU, instead
    # of T tiny per-step matmuls on the critical path.
    x2d = x_ref[...].reshape(T * B, I)
    gx = jnp.dot(x2d, wih_ref[...],
                 preferred_element_type=jnp.float32) + b_ref[...]   # (T*B, 4H)
    gx_scr[...] = gx.reshape(T, B, 4 * H)

    whh = whh_ref[...]                        # (H, 4H), loaded once, vreg-resident
    # TODO(synk): at production H, cast whh / gx matmul inputs to bf16 on
    # v6e/v7x (keep f32 accumulation via preferred_element_type and f32 gate math).

    h = jnp.zeros((B, H), jnp.float32)
    c = jnp.zeros((B, H), jnp.float32)

    # T is small & static -> fully unrolled loop gives the scheduler visibility.
    # TODO(synk): for large T switch to lax.fori_loop / a time-chunked grid.
    for t in range(T):
        # Time reversal for the backward direction via indexing only.
        ti = jnp.where(d == 0, t, T - 1 - t)
        gates = gx_scr[ti] + jnp.dot(h, whh,
                                     preferred_element_type=jnp.float32)  # (B, 4H)
        i_g = jax.nn.sigmoid(gates[:, 0 * H:1 * H])
        f_g = jax.nn.sigmoid(gates[:, 1 * H:2 * H])
        g_g = jnp.tanh(gates[:, 2 * H:3 * H])
        o_g = jax.nn.sigmoid(gates[:, 3 * H:4 * H])
        c = f_g * c + i_g * g_g
        h = o_g * jnp.tanh(c)
        out_ref[ti] = h                       # backward stored in original order


def bilstm_layer(x, wih, whh, b):
    """One bidirectional LSTM layer over the full sequence.

    x:   (T, B, I)    float32
    wih: (2, I, 4H)   float32  (W_ih transposed, per direction)
    whh: (2, H, 4H)   float32  (W_hh transposed, per direction)
    b:   (2, 1, 4H)   float32  (b_ih + b_hh, per direction)
    returns (2, T, B, H): [0] forward hiddens, [1] backward hiddens, both in
    original time order.
    """
    T, B, I = x.shape
    H = whh.shape[1]
    return pl.pallas_call(
        _bilstm_layer_kernel,
        out_shape=jax.ShapeDtypeStruct((2, T, B, H), jnp.float32),
        grid_spec=pltpu.PrefetchScalarGridSpec(
            num_scalar_prefetch=0,
            grid=(2,),                                        # direction axis
            in_specs=[
                pl.BlockSpec((T, B, I), lambda d: (0, 0, 0)),
                pl.BlockSpec((None, I, 4 * H), lambda d: (d, 0, 0)),
                pl.BlockSpec((None, H, 4 * H), lambda d: (d, 0, 0)),
                pl.BlockSpec((None, 1, 4 * H), lambda d: (d, 0, 0)),
            ],
            out_specs=pl.BlockSpec((None, T, B, H), lambda d: (d, 0, 0, 0)),
            scratch_shapes=[pltpu.VMEM((T, B, 4 * H), jnp.float32)],
        ),
        compiler_params=pltpu.CompilerParams(
            dimension_semantics=("parallel",)),               # 2x on v7x megacore
    )(x, wih, whh, b)


# ----------------------------------------------------------------------------
# Pallas kernel: final Linear + Softmax (output dim padded to 128 lanes).
# ----------------------------------------------------------------------------
def _fc_softmax_kernel(x_ref, w_ref, b_ref, o_ref):
    logits = (jnp.dot(x_ref[...], w_ref[...],
                      preferred_element_type=jnp.float32) + b_ref[...])
    o_ref[...] = jax.nn.softmax(logits, axis=-1)


def fc_softmax_padded(feature, w_pad, b_pad):
    """feature: (B, F), w_pad: (F, Np), b_pad: (1, Np) -> (B, Np) softmax."""
    B, F = feature.shape
    Np = w_pad.shape[1]
    return pl.pallas_call(
        _fc_softmax_kernel,
        out_shape=jax.ShapeDtypeStruct((B, Np), jnp.float32),
        grid_spec=pltpu.PrefetchScalarGridSpec(
            num_scalar_prefetch=0,
            grid=(1,),
            in_specs=[
                pl.BlockSpec((B, F), lambda i: (0, 0)),
                pl.BlockSpec((F, Np), lambda i: (0, 0)),
                pl.BlockSpec((1, Np), lambda i: (0, 0)),
            ],
            out_specs=pl.BlockSpec((B, Np), lambda i: (0, 0)),
        ),
        compiler_params=pltpu.CompilerParams(
            dimension_semantics=("arbitrary",)),
    )(feature, w_pad, b_pad)


# ----------------------------------------------------------------------------
# Full forward pass mirroring myLSTM.forward (eval mode: dropout = identity).
# ----------------------------------------------------------------------------
@functools.partial(jax.jit, static_argnames=("num_layers",))
def my_lstm_forward(tokens, emb_table, lstm_params, fc_w_t, fc_b, num_layers):
    # Embedding lookup (gather -> XLA glue).
    embedded = jnp.take(emb_table, tokens, axis=0)            # (T, B, E)

    layer_in = embedded
    h_finals = []
    for layer in range(num_layers):
        p = lstm_params[layer]
        out = bilstm_layer(layer_in, p["wih"], p["whh"], p["b"])  # (2, T, B, H)
        # h_n ordering: [layer*2 (fwd), layer*2+1 (bwd)]
        h_finals.append(out[0, -1])     # forward final hidden   (B, H)
        h_finals.append(out[1, 0])      # backward final hidden  (B, H)
        layer_in = jnp.concatenate([out[0], out[1]], axis=-1)    # (T, B, 2H)
        # TODO(synk): inter-layer dropout omitted (identity in eval mode).

    # torch.cat([h_n[i] for i in ...], dim=-1) -> (B, num_layers*2*H)
    feature_map = jnp.concatenate(h_finals, axis=-1)
    # TODO(synk): h_n dropout omitted (identity in eval mode).

    # Pad FC output dim to a lane-dense multiple of 128; padded logits get a
    # huge negative bias so softmax assigns them exactly 0 probability.
    O = fc_w_t.shape[1]
    O_pad = ((O + 127) // 128) * 128
    w_pad = jnp.pad(fc_w_t, ((0, 0), (0, O_pad - O)))
    b_pad = jnp.pad(fc_b, ((0, 0), (0, O_pad - O)), constant_values=-1e30)
    probs = fc_softmax_padded(feature_map, w_pad, b_pad)
    return probs[:, :O]


# ----------------------------------------------------------------------------
# Deterministic parameter construction (PyTorch-style uniform(-1/sqrt(H), k)).
# ----------------------------------------------------------------------------
def make_params(key, vocab_size, emb_size, hidden_size, num_layers,
                output_size):
    k_std = 1.0 / (hidden_size ** 0.5)

    def uni(k, shape):
        return jax.random.uniform(k, shape, jnp.float32, -k_std, k_std)

    keys = jax.random.split(key, 2 + num_layers)
    emb_table = jax.random.normal(keys[0], (vocab_size, emb_size),
                                  jnp.float32) * 0.1

    lstm_params = []
    for layer in range(num_layers):
        in_size = emb_size if layer == 0 else 2 * hidden_size
        lk = jax.random.split(keys[2 + layer], 8)
        wih = jnp.stack([uni(lk[0], (in_size, 4 * hidden_size)),
                         uni(lk[4], (in_size, 4 * hidden_size))])      # (2,in,4H)
        whh = jnp.stack([uni(lk[1], (hidden_size, 4 * hidden_size)),
                         uni(lk[5], (hidden_size, 4 * hidden_size))])  # (2,H,4H)
        b = jnp.stack([uni(lk[2], (1, 4 * hidden_size))
                       + uni(lk[3], (1, 4 * hidden_size)),
                       uni(lk[6], (1, 4 * hidden_size))
                       + uni(lk[7], (1, 4 * hidden_size))])            # (2,1,4H)
        lstm_params.append({"wih": wih, "whh": whh, "b": b})

    fk = jax.random.split(keys[1], 2)
    fc_in = num_layers * hidden_size * 2
    fc_bound = 1.0 / (fc_in ** 0.5)
    fc_w_t = jax.random.uniform(fk[0], (fc_in, output_size), jnp.float32,
                                -fc_bound, fc_bound)
    fc_b = jax.random.uniform(fk[1], (1, output_size), jnp.float32,
                              -fc_bound, fc_bound)
    return emb_table, lstm_params, fc_w_t, fc_b


if __name__ == "__main__":
    # Small config consistent with the module:
    vocab_size = 50
    embedding_size = 16
    hidden_size = 32
    num_layers = 2
    output_size = 4
    seq_len = 8
    batch = 8

    key = jax.random.PRNGKey(0)
    k_tok, k_par = jax.random.split(key)

    tokens = jax.random.randint(k_tok, (seq_len, batch), 0, vocab_size,
                                dtype=jnp.int32)              # (T, B)
    emb_table, lstm_params, fc_w_t, fc_b = make_params(
        k_par, vocab_size, embedding_size, hidden_size, num_layers,
        output_size)

    out = my_lstm_forward(tokens, emb_table, tuple(lstm_params),
                          fc_w_t, fc_b, num_layers=num_layers)
    out = jax.block_until_ready(out)

    assert out.shape == (batch, output_size)
    assert jnp.allclose(jnp.sum(out, axis=-1), 1.0, atol=1e-5)
    print("KERNEL_OK")
</pallas_src>

<mosaic_0001>
module attributes {stable_mosaic.version = 11 : i64} {
  func.func @_bilstm_layer_kernel(%arg0: i32, %arg1: memref<8x8x16xf32, #tpu.memory_space<vmem>>, %arg2: memref<1x16x128xf32, #tpu.memory_space<vmem>>, %arg3: memref<1x32x128xf32, #tpu.memory_space<vmem>>, %arg4: memref<1x1x128xf32, #tpu.memory_space<vmem>>, %arg5: memref<1x8x8x32xf32, #tpu.memory_space<vmem>>, %arg6: memref<8x8x128xf32, #tpu.memory_space<vmem>>) attributes {dimension_semantics = [#tpu.dimension_semantics<parallel>], iteration_bounds = array<i64: 2>, scalar_prefetch = 0 : i64, scratch_operands = 1 : i64, tpu.core_type = #tpu.core_type<tc>, window_params = [{pipeline_mode = #tpu.pipeline_mode<synchronous>, transform_indices = @transform_0, window_bounds = array<i64: 8, 8, 16>}, {transform_indices = @transform_1, window_bounds = array<i64: 1, 16, 128>}, {transform_indices = @transform_2, window_bounds = array<i64: 1, 32, 128>}, {transform_indices = @transform_3, window_bounds = array<i64: 1, 1, 128>}, {transform_indices = @transform_4, window_bounds = array<i64: 1, 8, 8, 32>}]} {
    %c0 = arith.constant 0 : index
    %c0_0 = arith.constant 0 : index
    %c0_1 = arith.constant 0 : index
    %0 = vector.load %arg1[%c0, %c0_0, %c0_1] : memref<8x8x16xf32, #tpu.memory_space<vmem>>, vector<8x8x16xf32>
    %1 = vector.shape_cast %0 : vector<8x8x16xf32> to vector<64x16xf32>
    %c0_2 = arith.constant 0 : index
    %c0_3 = arith.constant 0 : index
    %c0_4 = arith.constant 0 : index
    %2 = vector.load %arg2[%c0_2, %c0_3, %c0_4] : memref<1x16x128xf32, #tpu.memory_space<vmem>>, vector<1x16x128xf32>
    %3 = vector.shape_cast %2 : vector<1x16x128xf32> to vector<16x128xf32>
    %cst = arith.constant dense<0.000000e+00> : vector<64x128xf32>
    %4 = tpu.matmul %1, %3, %cst {dimension_numbers = #tpu.dot_dimension_numbers<[1], [0], [0], [1], [0, 0, 1, 1], [], []>} : vector<64x16xf32>, vector<16x128xf32>, vector<64x128xf32> -> vector<64x128xf32>
    %c0_5 = arith.constant 0 : index
    %c0_6 = arith.constant 0 : index
    %c0_7 = arith.constant 0 : index
    %5 = vector.load %arg4[%c0_5, %c0_6, %c0_7] : memref<1x1x128xf32, #tpu.memory_space<vmem>>, vector<1x1x128xf32>
    %6 = vector.shape_cast %5 : vector<1x1x128xf32> to vector<1x128xf32>
    %7 = vector.broadcast %6 : vector<1x128xf32> to vector<64x128xf32>
    %8 = arith.addf %4, %7 : vector<64x128xf32>
    %9 = vector.shape_cast %8 : vector<64x128xf32> to vector<8x8x128xf32>
    %c0_8 = arith.constant 0 : index
    %c0_9 = arith.constant 0 : index
    %c0_10 = arith.constant 0 : index
    %10 = vector.load %arg6[%c0_8, %c0_9, %c0_10] : memref<8x8x128xf32, #tpu.memory_space<vmem>>, vector<8x8x128xf32>
    tpu.vector_store %arg6[%c0_8, %c0_9, %c0_10], %9 {strides = array<i32>} : memref<8x8x128xf32, #tpu.memory_space<vmem>>, vector<8x8x128xf32>,
    %c0_11 = arith.constant 0 : index
    %c0_12 = arith.constant 0 : index
    %c0_13 = arith.constant 0 : index
    %11 = vector.load %arg3[%c0_11, %c0_12, %c0_13] : memref<1x32x128xf32, #tpu.memory_space<vmem>>, vector<1x32x128xf32>
    %12 = vector.shape_cast %11 : vector<1x32x128xf32> to vector<32x128xf32>
    %cst_14 = arith.constant 0.000000e+00 : f32
    %13 = vector.broadcast %cst_14 : f32 to vector<8x32xf32>
    %cst_15 = arith.constant 0.000000e+00 : f32
    %14 = vector.broadcast %cst_15 : f32 to vector<8x32xf32>
    %c0_i32 = arith.constant 0 : i32
    %15 = arith.cmpi eq, %arg0, %c0_i32 : i32
    %c0_i32_16 = arith.constant 0 : i32
    %c7_i32 = arith.constant 7 : i32
    %16 = arith.select %15, %c0_i32_16, %c7_i32 : i32
    %17 = arith.index_cast %16 : i32 to index
    %c0_17 = arith.constant 0 : index
    %c0_18 = arith.constant 0 : index
    %18 = vector.load %arg6[%17, %c0_17, %c0_18] : memref<8x8x128xf32, #tpu.memory_space<vmem>>, vector<1x8x128xf32>
    %19 = vector.shape_cast %18 : vector<1x8x128xf32> to vector<8x128xf32>
    %cst_19 = arith.constant dense<0.000000e+00> : vector<8x128xf32>
    %20 = tpu.matmul %13, %12, %cst_19 {dimension_numbers = #tpu.dot_dimension_numbers<[1], [0], [0], [1], [0, 0, 1, 1], [], []>} : vector<8x32xf32>, vector<32x128xf32>, vector<8x128xf32> -> vector<8x128xf32>
    %21 = arith.addf %19, %20 : vector<8x128xf32>
    %22 = vector.extract_strided_slice %21 {offsets = [0, 0], sizes = [8, 32], strides = [1, 1]} : vector<8x128xf32> to vector<8x32xf32>
    %23 = arith.negf %22 : vector<8x32xf32>
    %24 = math.exp %23 : vector<8x32xf32>
    %cst_20 = arith.constant 1.000000e+00 : f32
    %25 = vector.broadcast %cst_20 : f32 to vector<8x32xf32>
    %26 = arith.addf %25, %24 : vector<8x32xf32>
    %27 = arith.divf %25, %26 : vector<8x32xf32>
    %28 = vector.extract_strided_slice %21 {offsets = [0, 32], sizes = [8, 32], strides = [1, 1]} : vector<8x128xf32> to vector<8x32xf32>
    %29 = arith.negf %28 : vector<8x32xf32>
    %30 = math.exp %29 : vector<8x32xf32>
    %cst_21 = arith.constant 1.000000e+00 : f32
    %31 = vector.broadcast %cst_21 : f32 to vector<8x32xf32>
    %32 = arith.addf %31, %30 : vector<8x32xf32>
    %33 = arith.divf %31, %32 : vector<8x32xf32>
    %34 = vector.extract_strided_slice %21 {offsets = [0, 64], sizes = [8, 32], strides = [1, 1]} : vector<8x128xf32> to vector<8x32xf32>
    %35 = math.tanh %34 : vector<8x32xf32>
    %36 = vector.extract_strided_slice %21 {offsets = [0, 96], sizes = [8, 32], strides = [1, 1]} : vector<8x128xf32> to vector<8x32xf32>
    %37 = arith.negf %36 : vector<8x32xf32>
    %38 = math.exp %37 : vector<8x32xf32>
    %cst_22 = arith.constant 1.000000e+00 : f32
    %39 = vector.broadcast %cst_22 : f32 to vector<8x32xf32>
    %40 = arith.addf %39, %38 : vector<8x32xf32>
    %41 = arith.divf %39, %40 : vector<8x32xf32>
    %42 = arith.mulf %33, %14 : vector<8x32xf32>
    %43 = arith.mulf %27, %35 : vector<8x32xf32>
    %44 = arith.addf %42, %43 : vector<8x32xf32>
    %45 = math.tanh %44 : vector<8x32xf32>
    %46 = arith.mulf %41, %45 : vector<8x32xf32>
    %c0_23 = arith.constant 0 : index
    %47 = arith.index_cast %16 : i32 to index
    %c0_24 = arith.constant 0 : index
    %c0_25 = arith.constant 0 : index
    %48 = vector.load %arg5[%c0_23, %47, %c0_24, %c0_25] : memref<1x8x8x32xf32, #tpu.memory_space<vmem>>, vector<1x1x8x32xf32>
    %49 = vector.shape_cast %48 : vector<1x1x8x32xf32> to vector<8x32xf32>
    %50 = vector.shape_cast %46 : vector<8x32xf32> to vector<1x1x8x32xf32>
    tpu.vector_store %arg5[%c0_23, %47, %c0_24, %c0_25], %50 {strides = array<i32>} : memref<1x8x8x32xf32, #tpu.memory_space<vmem>>, vector<1x1x8x32xf32>,
    %c0_i32_26 = arith.constant 0 : i32
    %51 = arith.cmpi eq, %arg0, %c0_i32_26 : i32
    %c1_i32 = arith.constant 1 : i32
    %c6_i32 = arith.constant 6 : i32
    %52 = arith.select %51, %c1_i32, %c6_i32 : i32
    %53 = arith.index_cast %52 : i32 to index
    %c0_27 = arith.constant 0 : index
    %c0_28 = arith.constant 0 : index
    %54 = vector.load %arg6[%53, %c0_27, %c0_28] : memref<8x8x128xf32, #tpu.memory_space<vmem>>, vector<1x8x128xf32>
    %55 = vector.shape_cast %54 : vector<1x8x128xf32> to vector<8x128xf32>
    %cst_29 = arith.constant dense<0.000000e+00> : vector<8x128xf32>
    %56 = tpu.matmul %46, %12, %cst_29 {dimension_numbers = #tpu.dot_dimension_numbers<[1], [0], [0], [1], [0, 0, 1, 1], [], []>} : vector<8x32xf32>, vector<32x128xf32>, vector<8x128xf32> -> vector<8x128xf32>
    %57 = arith.addf %55, %56 : vector<8x128xf32>
    %58 = vector.extract_strided_slice %57 {offsets = [0, 0], sizes = [8, 32], strides = [1, 1]} : vector<8x128xf32> to vector<8x32xf32>
    %59 = arith.negf %58 : vector<8x32xf32>
    %60 = math.exp %59 : vector<8x32xf32>
    %cst_30 = arith.constant 1.000000e+00 : f32
    %61 = vector.broadcast %cst_30 : f32 to vector<8x32xf32>
    %62 = arith.addf %61, %60 : vector<8x32xf32>
    %63 = arith.divf %61, %62 : vector<8x32xf32>
    %64 = vector.extract_strided_slice %57 {offsets = [0, 32], sizes = [8, 32], strides = [1, 1]} : vector<8x128xf32> to vector<8x32xf32>
    %65 = arith.negf %64 : vector<8x32xf32>
    %66 = math.exp %65 : vector<8x32xf32>
    %cst_31 = arith.constant 1.000000e+00 : f32
    %67 = vector.broadcast %cst_31 : f32 to vector<8x32xf32>
    %68 = arith.addf %67, %66 : vector<8x32xf32>
    %69 = arith.divf %67, %68 : vector<8x32xf32>
    %70 = vector.extract_strided_slice %57 {offsets = [0, 64], sizes = [8, 32], strides = [1, 1]} : vector<8x128xf32> to vector<8x32xf32>
    %71 = math.tanh %70 : vector<8x32xf32>
    %72 = vector.extract_strided_slice %57 {offsets = [0, 96], sizes = [8, 32], strides = [1, 1]} : vector<8x128xf32> to vector<8x32xf32>
    %73 = arith.negf %72 : vector<8x32xf32>
    %74 = math.exp %73 : vector<8x32xf32>
    %cst_32 = arith.constant 1.000000e+00 : f32
    %75 = vector.broadcast %cst_32 : f32 to vector<8x32xf32>
    %76 = arith.addf %75, %74 : vector<8x32xf32>
    %77 = arith.divf %75, %76 : vector<8x32xf32>
    %78 = arith.mulf %69, %44 : vector<8x32xf32>
    %79 = arith.mulf %63, %71 : vector<8x32xf32>
    %80 = arith.addf %78, %79 : vector<8x32xf32>
    %81 = math.tanh %80 : vector<8x32xf32>
    %82 = arith.mulf %77, %81 : vector<8x32xf32>
    %c0_33 = arith.constant 0 : index
    %83 = arith.index_cast %52 : i32 to index
    %c0_34 = arith.constant 0 : index
    %c0_35 = arith.constant 0 : index
    %84 = vector.load %arg5[%c0_33, %83, %c0_34, %c0_35] : memref<1x8x8x32xf32, #tpu.memory_space<vmem>>, vector<1x1x8x32xf32>
    %85 = vector.shape_cast %84 : vector<1x1x8x32xf32> to vector<8x32xf32>
    %86 = vector.shape_cast %82 : vector<8x32xf32> to vector<1x1x8x32xf32>
    tpu.vector_store %arg5[%c0_33, %83, %c0_34, %c0_35], %86 {strides = array<i32>} : memref<1x8x8x32xf32, #tpu.memory_space<vmem>>, vector<1x1x8x32xf32>,
    %c0_i32_36 = arith.constant 0 : i32
    %87 = arith.cmpi eq, %arg0, %c0_i32_36 : i32
    %c2_i32 = arith.constant 2 : i32
    %c5_i32 = arith.constant 5 : i32
    %88 = arith.select %87, %c2_i32, %c5_i32 : i32
    %89 = arith.index_cast %88 : i32 to index
    %c0_37 = arith.constant 0 : index
    %c0_38 = arith.constant 0 : index
    %90 = vector.load %arg6[%89, %c0_37, %c0_38] : memref<8x8x128xf32, #tpu.memory_space<vmem>>, vector<1x8x128xf32>
    %91 = vector.shape_cast %90 : vector<1x8x128xf32> to vector<8x128xf32>
    %cst_39 = arith.constant dense<0.000000e+00> : vector<8x128xf32>
    %92 = tpu.matmul %82, %12, %cst_39 {dimension_numbers = #tpu.dot_dimension_numbers<[1], [0], [0], [1], [0, 0, 1, 1], [], []>} : vector<8x32xf32>, vector<32x128xf32>, vector<8x128xf32> -> vector<8x128xf32>
    %93 = arith.addf %91, %92 : vector<8x128xf32>
    %94 = vector.extract_strided_slice %93 {offsets = [0, 0], sizes = [8, 32], strides = [1, 1]} : vector<8x128xf32> to vector<8x32xf32>
    %95 = arith.negf %94 : vector<8x32xf32>
    %96 = math.exp %95 : vector<8x32xf32>
    %cst_40 = arith.constant 1.000000e+00 : f32
    %97 = vector.broadcast %cst_40 : f32 to vector<8x32xf32>
    %98 = arith.addf %97, %96 : vector<8x32xf32>
    %99 = arith.divf %97, %98 : vector<8x32xf32>
    %100 = vector.extract_strided_slice %93 {offsets = [0, 32], sizes = [8, 32], strides = [1, 1]} : vector<8x128xf32> to vector<8x32xf32>
    %101 = arith.negf %100 : vector<8x32xf32>
    %102 = math.exp %101 : vector<8x32xf32>
    %cst_41 = arith.constant 1.000000e+00 : f32
    %103 = vector.broadcast %cst_41 : f32 to vector<8x32xf32>
    %104 = arith.addf %103, %102 : vector<8x32xf32>
    %105 = arith.divf %103, %104 : vector<8x32xf32>
    %106 = vector.extract_strided_slice %93 {offsets = [0, 64], sizes = [8, 32], strides = [1, 1]} : vector<8x128xf32> to vector<8x32xf32>
    %107 = math.tanh %106 : vector<8x32xf32>
    %108 = vector.extract_strided_slice %93 {offsets = [0, 96], sizes = [8, 32], strides = [1, 1]} : vector<8x128xf32> to vector<8x32xf32>
    %109 = arith.negf %108 : vector<8x32xf32>
    %110 = math.exp %109 : vector<8x32xf32>
    %cst_42 = arith.constant 1.000000e+00 : f32
    %111 = vector.broadcast %cst_42 : f32 to vector<8x32xf32>
    %112 = arith.addf %111, %110 : vector<8x32xf32>
    %113 = arith.divf %111, %112 : vector<8x32xf32>
    %114 = arith.mulf %105, %80 : vector<8x32xf32>
    %115 = arith.mulf %99, %107 : vector<8x32xf32>
    %116 = arith.addf %114, %115 : vector<8x32xf32>
    %117 = math.tanh %116 : vector<8x32xf32>
    %118 = arith.mulf %113, %117 : vector<8x32xf32>
    %c0_43 = arith.constant 0 : index
    %119 = arith.index_cast %88 : i32 to index
    %c0_44 = arith.constant 0 : index
    %c0_45 = arith.constant 0 : index
    %120 = vector.load %arg5[%c0_43, %119, %c0_44, %c0_45] : memref<1x8x8x32xf32, #tpu.memory_space<vmem>>, vector<1x1x8x32xf32>
    %121 = vector.shape_cast %120 : vector<1x1x8x32xf32> to vector<8x32xf32>
    %122 = vector.shape_cast %118 : vector<8x32xf32> to vector<1x1x8x32xf32>
    tpu.vector_store %arg5[%c0_43, %119, %c0_44, %c0_45], %122 {strides = array<i32>} : memref<1x8x8x32xf32, #tpu.memory_space<vmem>>, vector<1x1x8x32xf32>,
    %c0_i32_46 = arith.constant 0 : i32
    %123 = arith.cmpi eq, %arg0, %c0_i32_46 : i32
    %c3_i32 = arith.constant 3 : i32
    %c4_i32 = arith.constant 4 : i32
    %124 = arith.select %123, %c3_i32, %c4_i32 : i32
    %125 = arith.index_cast %124 : i32 to index
    %c0_47 = arith.constant 0 : index
    %c0_48 = arith.constant 0 : index
    %126 = vector.load %arg6[%125, %c0_47, %c0_48] : memref<8x8x128xf32, #tpu.memory_space<vmem>>, vector<1x8x128xf32>
    %127 = vector.shape_cast %126 : vector<1x8x128xf32> to vector<8x128xf32>
    %cst_49 = arith.constant dense<0.000000e+00> : vector<8x128xf32>
    %128 = tpu.matmul %118, %12, %cst_49 {dimension_numbers = #tpu.dot_dimension_numbers<[1], [0], [0], [1], [0, 0, 1, 1], [], []>} : vector<8x32xf32>, vector<32x128xf32>, vector<8x128xf32> -> vector<8x128xf32>
    %129 = arith.addf %127, %128 : vector<8x128xf32>
    %130 = vector.extract_strided_slice %129 {offsets = [0, 0], sizes = [8, 32], strides = [1, 1]} : vector<8x128xf32> to vector<8x32xf32>
    %131 = arith.negf %130 : vector<8x32xf32>
    %132 = math.exp %131 : vector<8x32xf32>
    %cst_50 = arith.constant 1.000000e+00 : f32
    %133 = vector.broadcast %cst_50 : f32 to vector<8x32xf32>
    %134 = arith.addf %133, %132 : vector<8x32xf32>
    %135 = arith.divf %133, %134 : vector<8x32xf32>
    %136 = vector.extract_strided_slice %129 {offsets = [0, 32], sizes = [8, 32], strides = [1, 1]} : vector<8x128xf32> to vector<8x32xf32>
    %137 = arith.negf %136 : vector<8x32xf32>
    %138 = math.exp %137 : vector<8x32xf32>
    %cst_51 = arith.constant 1.000000e+00 : f32
    %139 = vector.broadcast %cst_51 : f32 to vector<8x32xf32>
    %140 = arith.addf %139, %138 : vector<8x32xf32>
    %141 = arith.divf %139, %140 : vector<8x32xf32>
    %142 = vector.extract_strided_slice %129 {offsets = [0, 64], sizes = [8, 32], strides = [1, 1]} : vector<8x128xf32> to vector<8x32xf32>
    %143 = math.tanh %142 : vector<8x32xf32>
    %144 = vector.extract_strided_slice %129 {offsets = [0, 96], sizes = [8, 32], strides = [1, 1]} : vector<8x128xf32> to vector<8x32xf32>
    %145 = arith.negf %144 : vector<8x32xf32>
    %146 = math.exp %145 : vector<8x32xf32>
    %cst_52 = arith.constant 1.000000e+00 : f32
    %147 = vector.broadcast %cst_52 : f32 to vector<8x32xf32>
    %148 = arith.addf %147, %146 : vector<8x32xf32>
    %149 = arith.divf %147, %148 : vector<8x32xf32>
    %150 = arith.mulf %141, %116 : vector<8x32xf32>
    %151 = arith.mulf %135, %143 : vector<8x32xf32>
    %152 = arith.addf %150, %151 : vector<8x32xf32>
    %153 = math.tanh %152 : vector<8x32xf32>
    %154 = arith.mulf %149, %153 : vector<8x32xf32>
    %c0_53 = arith.constant 0 : index
    %155 = arith.index_cast %124 : i32 to index
    %c0_54 = arith.constant 0 : index
    %c0_55 = arith.constant 0 : index
    %156 = vector.load %arg5[%c0_53, %155, %c0_54, %c0_55] : memref<1x8x8x32xf32, #tpu.memory_space<vmem>>, vector<1x1x8x32xf32>
    %157 = vector.shape_cast %156 : vector<1x1x8x32xf32> to vector<8x32xf32>
    %158 = vector.shape_cast %154 : vector<8x32xf32> to vector<1x1x8x32xf32>
    tpu.vector_store %arg5[%c0_53, %155, %c0_54, %c0_55], %158 {strides = array<i32>} : memref<1x8x8x32xf32, #tpu.memory_space<vmem>>, vector<1x1x8x32xf32>,
    %c0_i32_56 = arith.constant 0 : i32
    %159 = arith.cmpi eq, %arg0, %c0_i32_56 : i32
    %c4_i32_57 = arith.constant 4 : i32
    %c3_i32_58 = arith.constant 3 : i32
    %160 = arith.select %159, %c4_i32_57, %c3_i32_58 : i32
    %161 = arith.index_cast %160 : i32 to index
    %c0_59 = arith.constant 0 : index
    %c0_60 = arith.constant 0 : index
    %162 = vector.load %arg6[%161, %c0_59, %c0_60] : memref<8x8x128xf32, #tpu.memory_space<vmem>>, vector<1x8x128xf32>
    %163 = vector.shape_cast %162 : vector<1x8x128xf32> to vector<8x128xf32>
    %cst_61 = arith.constant dense<0.000000e+00> : vector<8x128xf32>
    %164 = tpu.matmul %154, %12, %cst_61 {dimension_numbers = #tpu.dot_dimension_numbers<[1], [0], [0], [1], [0, 0, 1, 1], [], []>} : vector<8x32xf32>, vector<32x128xf32>, vector<8x128xf32> -> vector<8x128xf32>
    %165 = arith.addf %163, %164 : vector<8x128xf32>
    %166 = vector.extract_strided_slice %165 {offsets = [0, 0], sizes = [8, 32], strides = [1, 1]} : vector<8x128xf32> to vector<8x32xf32>
    %167 = arith.negf %166 : vector<8x32xf32>
    %168 = math.exp %167 : vector<8x32xf32>
    %cst_62 = arith.constant 1.000000e+00 : f32
    %169 = vector.broadcast %cst_62 : f32 to vector<8x32xf32>
    %170 = arith.addf %169, %168 : vector<8x32xf32>
    %171 = arith.divf %169, %170 : vector<8x32xf32>
    %172 = vector.extract_strided_slice %165 {offsets = [0, 32], sizes = [8, 32], strides = [1, 1]} : vector<8x128xf32> to vector<8x32xf32>
    %173 = arith.negf %172 : vector<8x32xf32>
    %174 = math.exp %173 : vector<8x32xf32>
    %cst_63 = arith.constant 1.000000e+00 : f32
    %175 = vector.broadcast %cst_63 : f32 to vector<8x32xf32>
    %176 = arith.addf %175, %174 : vector<8x32xf32>
    %177 = arith.divf %175, %176 : vector<8x32xf32>
    %178 = vector.extract_strided_slice %165 {offsets = [0, 64], sizes = [8, 32], strides = [1, 1]} : vector<8x128xf32> to vector<8x32xf32>
    %179 = math.tanh %178 : vector<8x32xf32>
    %180 = vector.extract_strided_slice %165 {offsets = [0, 96], sizes = [8, 32], strides = [1, 1]} : vector<8x128xf32> to vector<8x32xf32>
    %181 = arith.negf %180 : vector<8x32xf32>
    %182 = math.exp %181 : vector<8x32xf32>
    %cst_64 = arith.constant 1.000000e+00 : f32
    %183 = vector.broadcast %cst_64 : f32 to vector<8x32xf32>
    %184 = arith.addf %183, %182 : vector<8x32xf32>
    %185 = arith.divf %183, %184 : vector<8x32xf32>
    %186 = arith.mulf %177, %152 : vector<8x32xf32>
    %187 = arith.mulf %171, %179 : vector<8x32xf32>
    %188 = arith.addf %186, %187 : vector<8x32xf32>
    %189 = math.tanh %188 : vector<8x32xf32>
    %190 = arith.mulf %185, %189 : vector<8x32xf32>
    %c0_65 = arith.constant 0 : index
    %191 = arith.index_cast %160 : i32 to index
    %c0_66 = arith.constant 0 : index
    %c0_67 = arith.constant 0 : index
    %192 = vector.load %arg5[%c0_65, %191, %c0_66, %c0_67] : memref<1x8x8x32xf32, #tpu.memory_space<vmem>>, vector<1x1x8x32xf32>
    %193 = vector.shape_cast %192 : vector<1x1x8x32xf32> to vector<8x32xf32>
    %194 = vector.shape_cast %190 : vector<8x32xf32> to vector<1x1x8x32xf32>
    tpu.vector_store %arg5[%c0_65, %191, %c0_66, %c0_67], %194 {strides = array<i32>} : memref<1x8x8x32xf32, #tpu.memory_space<vmem>>, vector<1x1x8x32xf32>,
    %c0_i32_68 = arith.constant 0 : i32
    %195 = arith.cmpi eq, %arg0, %c0_i32_68 : i32
    %c5_i32_69 = arith.constant 5 : i32
    %c2_i32_70 = arith.constant 2 : i32
    %196 = arith.select %195, %c5_i32_69, %c2_i32_70 : i32
    %197 = arith.index_cast %196 : i32 to index
    %c0_71 = arith.constant 0 : index
    %c0_72 = arith.constant 0 : index
    %198 = vector.load %arg6[%197, %c0_71, %c0_72] : memref<8x8x128xf32, #tpu.memory_space<vmem>>, vector<1x8x128xf32>
    %199 = vector.shape_cast %198 : vector<1x8x128xf32> to vector<8x128xf32>
    %cst_73 = arith.constant dense<0.000000e+00> : vector<8x128xf32>
    %200 = tpu.matmul %190, %12, %cst_73 {dimension_numbers = #tpu.dot_dimension_numbers<[1], [0], [0], [1], [0, 0, 1, 1], [], []>} : vector<8x32xf32>, vector<32x128xf32>, vector<8x128xf32> -> vector<8x128xf32>
    %201 = arith.addf %199, %200 : vector<8x128xf32>
    %202 = vector.extract_strided_slice %201 {offsets = [0, 0], sizes = [8, 32], strides = [1, 1]} : vector<8x128xf32> to vector<8x32xf32>
    %203 = arith.negf %202 : vector<8x32xf32>
    %204 = math.exp %203 : vector<8x32xf32>
    %cst_74 = arith.constant 1.000000e+00 : f32
    %205 = vector.broadcast %cst_74 : f32 to vector<8x32xf32>
    %206 = arith.addf %205, %204 : vector<8x32xf32>
    %207 = arith.divf %205, %206 : vector<8x32xf32>
    %208 = vector.extract_strided_slice %201 {offsets = [0, 32], sizes = [8, 32], strides = [1, 1]} : vector<8x128xf32> to vector<8x32xf32>
    %209 = arith.negf %208 : vector<8x32xf32>
    %210 = math.exp %209 : vector<8x32xf32>
    %cst_75 = arith.constant 1.000000e+00 : f32
    %211 = vector.broadcast %cst_75 : f32 to vector<8x32xf32>
    %212 = arith.addf %211, %210 : vector<8x32xf32>
    %213 = arith.divf %211, %212 : vector<8x32xf32>
    %214 = vector.extract_strided_slice %201 {offsets = [0, 64], sizes = [8, 32], strides = [1, 1]} : vector<8x128xf32> to vector<8x32xf32>
    %215 = math.tanh %214 : vector<8x32xf32>
    %216 = vector.extract_strided_slice %201 {offsets = [0, 96], sizes = [8, 32], strides = [1, 1]} : vector<8x128xf32> to vector<8x32xf32>
    %217 = arith.negf %216 : vector<8x32xf32>
    %218 = math.exp %217 : vector<8x32xf32>
    %cst_76 = arith.constant 1.000000e+00 : f32
    %219 = vector.broadcast %cst_76 : f32 to vector<8x32xf32>
    %220 = arith.addf %219, %218 : vector<8x32xf32>
    %221 = arith.divf %219, %220 : vector<8x32xf32>
    %222 = arith.mulf %213, %188 : vector<8x32xf32>
    %223 = arith.mulf %207, %215 : vector<8x32xf32>
    %224 = arith.addf %222, %223 : vector<8x32xf32>
    %225 = math.tanh %224 : vector<8x32xf32>
    %226 = arith.mulf %221, %225 : vector<8x32xf32>
    %c0_77 = arith.constant 0 : index
    %227 = arith.index_cast %196 : i32 to index
    %c0_78 = arith.constant 0 : index
    %c0_79 = arith.constant 0 : index
    %228 = vector.load %arg5[%c0_77, %227, %c0_78, %c0_79] : memref<1x8x8x32xf32, #tpu.memory_space<vmem>>, vector<1x1x8x32xf32>
    %229 = vector.shape_cast %228 : vector<1x1x8x32xf32> to vector<8x32xf32>
    %230 = vector.shape_cast %226 : vector<8x32xf32> to vector<1x1x8x32xf32>
    tpu.vector_store %arg5[%c0_77, %227, %c0_78, %c0_79], %230 {strides = array<i32>} : memref<1x8x8x32xf32, #tpu.memory_space<vmem>>, vector<1x1x8x32xf32>,
    %c0_i32_80 = arith.constant 0 : i32
    %231 = arith.cmpi eq, %arg0, %c0_i32_80 : i32
    %c6_i32_81 = arith.constant 6 : i32
    %c1_i32_82 = arith.constant 1 : i32
    %232 = arith.select %231, %c6_i32_81, %c1_i32_82 : i32
    %233 = arith.index_cast %232 : i32 to index
    %c0_83 = arith.constant 0 : index
    %c0_84 = arith.constant 0 : index
    %234 = vector.load %arg6[%233, %c0_83, %c0_84] : memref<8x8x128xf32, #tpu.memory_space<vmem>>, vector<1x8x128xf32>
    %235 = vector.shape_cast %234 : vector<1x8x128xf32> to vector<8x128xf32>
    %cst_85 = arith.constant dense<0.000000e+00> : vector<8x128xf32>
    %236 = tpu.matmul %226, %12, %cst_85 {dimension_numbers = #tpu.dot_dimension_numbers<[1], [0], [0], [1], [0, 0, 1, 1], [], []>} : vector<8x32xf32>, vector<32x128xf32>, vector<8x128xf32> -> vector<8x128xf32>
    %237 = arith.addf %235, %236 : vector<8x128xf32>
    %238 = vector.extract_strided_slice %237 {offsets = [0, 0], sizes = [8, 32], strides = [1, 1]} : vector<8x128xf32> to vector<8x32xf32>
    %239 = arith.negf %238 : vector<8x32xf32>
    %240 = math.exp %239 : vector<8x32xf32>
    %cst_86 = arith.constant 1.000000e+00 : f32
    %241 = vector.broadcast %cst_86 : f32 to vector<8x32xf32>
    %242 = arith.addf %241, %240 : vector<8x32xf32>
    %243 = arith.divf %241, %242 : vector<8x32xf32>
    %244 = vector.extract_strided_slice %237 {offsets = [0, 32], sizes = [8, 32], strides = [1, 1]} : vector<8x128xf32> to vector<8x32xf32>
    %245 = arith.negf %244 : vector<8x32xf32>
    %246 = math.exp %245 : vector<8x32xf32>
    %cst_87 = arith.constant 1.000000e+00 : f32
    %247 = vector.broadcast %cst_87 : f32 to vector<8x32xf32>
    %248 = arith.addf %247, %246 : vector<8x32xf32>
    %249 = arith.divf %247, %248 : vector<8x32xf32>
    %250 = vector.extract_strided_slice %237 {offsets = [0, 64], sizes = [8, 32], strides = [1, 1]} : vector<8x128xf32> to vector<8x32xf32>
    %251 = math.tanh %250 : vector<8x32xf32>
    %252 = vector.extract_strided_slice %237 {offsets = [0, 96], sizes = [8, 32], strides = [1, 1]} : vector<8x128xf32> to vector<8x32xf32>
    %253 = arith.negf %252 : vector<8x32xf32>
    %254 = math.exp %253 : vector<8x32xf32>
    %cst_88 = arith.constant 1.000000e+00 : f32
    %255 = vector.broadcast %cst_88 : f32 to vector<8x32xf32>
    %256 = arith.addf %255, %254 : vector<8x32xf32>
    %257 = arith.divf %255, %256 : vector<8x32xf32>
    %258 = arith.mulf %249, %224 : vector<8x32xf32>
    %259 = arith.mulf %243, %251 : vector<8x32xf32>
    %260 = arith.addf %258, %259 : vector<8x32xf32>
    %261 = math.tanh %260 : vector<8x32xf32>
    %262 = arith.mulf %257, %261 : vector<8x32xf32>
    %c0_89 = arith.constant 0 : index
    %263 = arith.index_cast %232 : i32 to index
    %c0_90 = arith.constant 0 : index
    %c0_91 = arith.constant 0 : index
    %264 = vector.load %arg5[%c0_89, %263, %c0_90, %c0_91] : memref<1x8x8x32xf32, #tpu.memory_space<vmem>>, vector<1x1x8x32xf32>
    %265 = vector.shape_cast %264 : vector<1x1x8x32xf32> to vector<8x32xf32>
    %266 = vector.shape_cast %262 : vector<8x32xf32> to vector<1x1x8x32xf32>
    tpu.vector_store %arg5[%c0_89, %263, %c0_90, %c0_91], %266 {strides = array<i32>} : memref<1x8x8x32xf32, #tpu.memory_space<vmem>>, vector<1x1x8x32xf32>,
    %c0_i32_92 = arith.constant 0 : i32
    %267 = arith.cmpi eq, %arg0, %c0_i32_92 : i32
    %c7_i32_93 = arith.constant 7 : i32
    %c0_i32_94 = arith.constant 0 : i32
    %268 = arith.select %267, %c7_i32_93, %c0_i32_94 : i32
    %269 = arith.index_cast %268 : i32 to index
    %c0_95 = arith.constant 0 : index
    %c0_96 = arith.constant 0 : index
    %270 = vector.load %arg6[%269, %c0_95, %c0_96] : memref<8x8x128xf32, #tpu.memory_space<vmem>>, vector<1x8x128xf32>
    %271 = vector.shape_cast %270 : vector<1x8x128xf32> to vector<8x128xf32>
    %cst_97 = arith.constant dense<0.000000e+00> : vector<8x128xf32>
    %272 = tpu.matmul %262, %12, %cst_97 {dimension_numbers = #tpu.dot_dimension_numbers<[1], [0], [0], [1], [0, 0, 1, 1], [], []>} : vector<8x32xf32>, vector<32x128xf32>, vector<8x128xf32> -> vector<8x128xf32>
    %273 = arith.addf %271, %272 : vector<8x128xf32>
    %274 = vector.extract_strided_slice %273 {offsets = [0, 0], sizes = [8, 32], strides = [1, 1]} : vector<8x128xf32> to vector<8x32xf32>
    %275 = arith.negf %274 : vector<8x32xf32>
    %276 = math.exp %275 : vector<8x32xf32>
    %cst_98 = arith.constant 1.000000e+00 : f32
    %277 = vector.broadcast %cst_98 : f32 to vector<8x32xf32>
    %278 = arith.addf %277, %276 : vector<8x32xf32>
    %279 = arith.divf %277, %278 : vector<8x32xf32>
    %280 = vector.extract_strided_slice %273 {offsets = [0, 32], sizes = [8, 32], strides = [1, 1]} : vector<8x128xf32> to vector<8x32xf32>
    %281 = arith.negf %280 : vector<8x32xf32>
    %282 = math.exp %281 : vector<8x32xf32>
    %cst_99 = arith.constant 1.000000e+00 : f32
    %283 = vector.broadcast %cst_99 : f32 to vector<8x32xf32>
    %284 = arith.addf %283, %282 : vector<8x32xf32>
    %285 = arith.divf %283, %284 : vector<8x32xf32>
    %286 = vector.extract_strided_slice %273 {offsets = [0, 64], sizes = [8, 32], strides = [1, 1]} : vector<8x128xf32> to vector<8x32xf32>
    %287 = math.tanh %286 : vector<8x32xf32>
    %288 = vector.extract_strided_slice %273 {offsets = [0, 96], sizes = [8, 32], strides = [1, 1]} : vector<8x128xf32> to vector<8x32xf32>
    %289 = arith.negf %288 : vector<8x32xf32>
    %290 = math.exp %289 : vector<8x32xf32>
    %cst_100 = arith.constant 1.000000e+00 : f32
    %291 = vector.broadcast %cst_100 : f32 to vector<8x32xf32>
    %292 = arith.addf %291, %290 : vector<8x32xf32>
    %293 = arith.divf %291, %292 : vector<8x32xf32>
    %294 = arith.mulf %285, %260 : vector<8x32xf32>
    %295 = arith.mulf %279, %287 : vector<8x32xf32>
    %296 = arith.addf %294, %295 : vector<8x32xf32>
    %297 = math.tanh %296 : vector<8x32xf32>
    %298 = arith.mulf %293, %297 : vector<8x32xf32>
    %c0_101 = arith.constant 0 : index
    %299 = arith.index_cast %268 : i32 to index
    %c0_102 = arith.constant 0 : index
    %c0_103 = arith.constant 0 : index
    %300 = vector.load %arg5[%c0_101, %299, %c0_102, %c0_103] : memref<1x8x8x32xf32, #tpu.memory_space<vmem>>, vector<1x1x8x32xf32>
    %301 = vector.shape_cast %300 : vector<1x1x8x32xf32> to vector<8x32xf32>
    %302 = vector.shape_cast %298 : vector<8x32xf32> to vector<1x1x8x32xf32>
    tpu.vector_store %arg5[%c0_101, %299, %c0_102, %c0_103], %302 {strides = array<i32>} : memref<1x8x8x32xf32, #tpu.memory_space<vmem>>, vector<1x1x8x32xf32>,
    return
  }
  func.func @transform_0(%arg0: i32) -> (i32, i32, i32) {
    %c0_i32 = arith.constant 0 : i32
    %c0_i32_0 = arith.constant 0 : i32
    %c0_i32_1 = arith.constant 0 : i32
    %c0_i32_2 = arith.constant 0 : i32
    return %c0_i32, %c0_i32_0, %c0_i32_1 : i32, i32, i32
  }
  func.func @transform_1(%arg0: i32) -> (i32, i32, i32) {
    %c0_i32 = arith.constant 0 : i32
    %c0_i32_0 = arith.constant 0 : i32
    %c0_i32_1 = arith.constant 0 : i32
    return %arg0, %c0_i32, %c0_i32_0 : i32, i32, i32
  }
  func.func @transform_2(%arg0: i32) -> (i32, i32, i32) {
    %c0_i32 = arith.constant 0 : i32
    %c0_i32_0 = arith.constant 0 : i32
    %c0_i32_1 = arith.constant 0 : i32
    return %arg0, %c0_i32, %c0_i32_0 : i32, i32, i32
  }
  func.func @transform_3(%arg0: i32) -> (i32, i32, i32) {
    %c0_i32 = arith.constant 0 : i32
    %c0_i32_0 = arith.constant 0 : i32
    %c0_i32_1 = arith.constant 0 : i32
    return %arg0, %c0_i32, %c0_i32_0 : i32, i32, i32
  }
  func.func @transform_4(%arg0: i32) -> (i32, i32, i32, i32) {
    %c0_i32 = arith.constant 0 : i32
    %c0_i32_0 = arith.constant 0 : i32
    %c0_i32_1 = arith.constant 0 : i32
    %c0_i32_2 = arith.constant 0 : i32
    return %arg0, %c0_i32, %c0_i32_0, %c0_i32_1 : i32, i32, i32, i32
  }
}

module attributes {stable_mosaic.version = 11 : i64} {
  func.func @_bilstm_layer_kernel(%arg0: i32, %arg1: memref<8x8x64xf32, #tpu.memory_space<vmem>>, %arg2: memref<1x64x128xf32, #tpu.memory_space<vmem>>, %arg3: memref<1x32x128xf32, #tpu.memory_space<vmem>>, %arg4: memref<1x1x128xf32, #tpu.memory_space<vmem>>, %arg5: memref<1x8x8x32xf32, #tpu.memory_space<vmem>>, %arg6: memref<8x8x128xf32, #tpu.memory_space<vmem>>) attributes {dimension_semantics = [#tpu.dimension_semantics<parallel>], iteration_bounds = array<i64: 2>, scalar_prefetch = 0 : i64, scratch_operands = 1 : i64, tpu.core_type = #tpu.core_type<tc>, window_params = [{pipeline_mode = #tpu.pipeline_mode<synchronous>, transform_indices = @transform_0, window_bounds = array<i64: 8, 8, 64>}, {transform_indices = @transform_1, window_bounds = array<i64: 1, 64, 128>}, {transform_indices = @transform_2, window_bounds = array<i64: 1, 32, 128>}, {transform_indices = @transform_3, window_bounds = array<i64: 1, 1, 128>}, {transform_indices = @transform_4, window_bounds = array<i64: 1, 8, 8, 32>}]} {
    %c0 = arith.constant 0 : index
    %c0_0 = arith.constant 0 : index
    %c0_1 = arith.constant 0 : index
    %0 = vector.load %arg1[%c0, %c0_0, %c0_1] : memref<8x8x64xf32, #tpu.memory_space<vmem>>, vector<8x8x64xf32>
    %1 = vector.shape_cast %0 : vector<8x8x64xf32> to vector<64x64xf32>
    %c0_2 = arith.constant 0 : index
    %c0_3 = arith.constant 0 : index
    %c0_4 = arith.constant 0 : index
    %2 = vector.load %arg2[%c0_2, %c0_3, %c0_4] : memref<1x64x128xf32, #tpu.memory_space<vmem>>, vector<1x64x128xf32>
    %3 = vector.shape_cast %2 : vector<1x64x128xf32> to vector<64x128xf32>
    %cst = arith.constant dense<0.000000e+00> : vector<64x128xf32>
    %4 = tpu.matmul %1, %3, %cst {dimension_numbers = #tpu.dot_dimension_numbers<[1], [0], [0], [1], [0, 0, 1, 1], [], []>} : vector<64x64xf32>, vector<64x128xf32>, vector<64x128xf32> -> vector<64x128xf32>
    %c0_5 = arith.constant 0 : index
    %c0_6 = arith.constant 0 : index
    %c0_7 = arith.constant 0 : index
    %5 = vector.load %arg4[%c0_5, %c0_6, %c0_7] : memref<1x1x128xf32, #tpu.memory_space<vmem>>, vector<1x1x128xf32>
    %6 = vector.shape_cast %5 : vector<1x1x128xf32> to vector<1x128xf32>
    %7 = vector.broadcast %6 : vector<1x128xf32> to vector<64x128xf32>
    %8 = arith.addf %4, %7 : vector<64x128xf32>
    %9 = vector.shape_cast %8 : vector<64x128xf32> to vector<8x8x128xf32>
    %c0_8 = arith.constant 0 : index
    %c0_9 = arith.constant 0 : index
    %c0_10 = arith.constant 0 : index
    %10 = vector.load %arg6[%c0_8, %c0_9, %c0_10] : memref<8x8x128xf32, #tpu.memory_space<vmem>>, vector<8x8x128xf32>
    tpu.vector_store %arg6[%c0_8, %c0_9, %c0_10], %9 {strides = array<i32>} : memref<8x8x128xf32, #tpu.memory_space<vmem>>, vector<8x8x128xf32>,
    %c0_11 = arith.constant 0 : index
    %c0_12 = arith.constant 0 : index
    %c0_13 = arith.constant 0 : index
    %11 = vector.load %arg3[%c0_11, %c0_12, %c0_13] : memref<1x32x128xf32, #tpu.memory_space<vmem>>, vector<1x32x128xf32>
    %12 = vector.shape_cast %11 : vector<1x32x128xf32> to vector<32x128xf32>
    %cst_14 = arith.constant 0.000000e+00 : f32
    %13 = vector.broadcast %cst_14 : f32 to vector<8x32xf32>
    %cst_15 = arith.constant 0.000000e+00 : f32
    %14 = vector.broadcast %cst_15 : f32 to vector<8x32xf32>
    %c0_i32 = arith.constant 0 : i32
    %15 = arith.cmpi eq, %arg0, %c0_i32 : i32
    %c0_i32_16 = arith.constant 0 : i32
    %c7_i32 = arith.constant 7 : i32
    %16 = arith.select %15, %c0_i32_16, %c7_i32 : i32
    %17 = arith.index_cast %16 : i32 to index
    %c0_17 = arith.constant 0 : index
    %c0_18 = arith.constant 0 : index
    %18 = vector.load %arg6[%17, %c0_17, %c0_18] : memref<8x8x128xf32, #tpu.memory_space<vmem>>, vector<1x8x128xf32>
    %19 = vector.shape_cast %18 : vector<1x8x128xf32> to vector<8x128xf32>
    %cst_19 = arith.constant dense<0.000000e+00> : vector<8x128xf32>
    %20 = tpu.matmul %13, %12, %cst_19 {dimension_numbers = #tpu.dot_dimension_numbers<[1], [0], [0], [1], [0, 0, 1, 1], [], []>} : vector<8x32xf32>, vector<32x128xf32>, vector<8x128xf32> -> vector<8x128xf32>
    %21 = arith.addf %19, %20 : vector<8x128xf32>
    %22 = vector.extract_strided_slice %21 {offsets = [0, 0], sizes = [8, 32], strides = [1, 1]} : vector<8x128xf32> to vector<8x32xf32>
    %23 = arith.negf %22 : vector<8x32xf32>
    %24 = math.exp %23 : vector<8x32xf32>
    %cst_20 = arith.constant 1.000000e+00 : f32
    %25 = vector.broadcast %cst_20 : f32 to vector<8x32xf32>
    %26 = arith.addf %25, %24 : vector<8x32xf32>
    %27 = arith.divf %25, %26 : vector<8x32xf32>
    %28 = vector.extract_strided_slice %21 {offsets = [0, 32], sizes = [8, 32], strides = [1, 1]} : vector<8x128xf32> to vector<8x32xf32>
    %29 = arith.negf %28 : vector<8x32xf32>
    %30 = math.exp %29 : vector<8x32xf32>
    %cst_21 = arith.constant 1.000000e+00 : f32
    %31 = vector.broadcast %cst_21 : f32 to vector<8x32xf32>
    %32 = arith.addf %31, %30 : vector<8x32xf32>
    %33 = arith.divf %31, %32 : vector<8x32xf32>
    %34 = vector.extract_strided_slice %21 {offsets = [0, 64], sizes = [8, 32], strides = [1, 1]} : vector<8x128xf32> to vector<8x32xf32>
    %35 = math.tanh %34 : vector<8x32xf32>
    %36 = vector.extract_strided_slice %21 {offsets = [0, 96], sizes = [8, 32], strides = [1, 1]} : vector<8x128xf32> to vector<8x32xf32>
    %37 = arith.negf %36 : vector<8x32xf32>
    %38 = math.exp %37 : vector<8x32xf32>
    %cst_22 = arith.constant 1.000000e+00 : f32
    %39 = vector.broadcast %cst_22 : f32 to vector<8x32xf32>
    %40 = arith.addf %39, %38 : vector<8x32xf32>
    %41 = arith.divf %39, %40 : vector<8x32xf32>
    %42 = arith.mulf %33, %14 : vector<8x32xf32>
    %43 = arith.mulf %27, %35 : vector<8x32xf32>
    %44 = arith.addf %42, %43 : vector<8x32xf32>
    %45 = math.tanh %44 : vector<8x32xf32>
    %46 = arith.mulf %41, %45 : vector<8x32xf32>
    %c0_23 = arith.constant 0 : index
    %47 = arith.index_cast %16 : i32 to index
    %c0_24 = arith.constant 0 : index
    %c0_25 = arith.constant 0 : index
    %48 = vector.load %arg5[%c0_23, %47, %c0_24, %c0_25] : memref<1x8x8x32xf32, #tpu.memory_space<vmem>>, vector<1x1x8x32xf32>
    %49 = vector.shape_cast %48 : vector<1x1x8x32xf32> to vector<8x32xf32>
    %50 = vector.shape_cast %46 : vector<8x32xf32> to vector<1x1x8x32xf32>
    tpu.vector_store %arg5[%c0_23, %47, %c0_24, %c0_25], %50 {strides = array<i32>} : memref<1x8x8x32xf32, #tpu.memory_space<vmem>>, vector<1x1x8x32xf32>,
    %c0_i32_26 = arith.constant 0 : i32
    %51 = arith.cmpi eq, %arg0, %c0_i32_26 : i32
    %c1_i32 = arith.constant 1 : i32
    %c6_i32 = arith.constant 6 : i32
    %52 = arith.select %51, %c1_i32, %c6_i32 : i32
    %53 = arith.index_cast %52 : i32 to index
    %c0_27 = arith.constant 0 : index
    %c0_28 = arith.constant 0 : index
    %54 = vector.load %arg6[%53, %c0_27, %c0_28] : memref<8x8x128xf32, #tpu.memory_space<vmem>>, vector<1x8x128xf32>
    %55 = vector.shape_cast %54 : vector<1x8x128xf32> to vector<8x128xf32>
    %cst_29 = arith.constant dense<0.000000e+00> : vector<8x128xf32>
    %56 = tpu.matmul %46, %12, %cst_29 {dimension_numbers = #tpu.dot_dimension_numbers<[1], [0], [0], [1], [0, 0, 1, 1], [], []>} : vector<8x32xf32>, vector<32x128xf32>, vector<8x128xf32> -> vector<8x128xf32>
    %57 = arith.addf %55, %56 : vector<8x128xf32>
    %58 = vector.extract_strided_slice %57 {offsets = [0, 0], sizes = [8, 32], strides = [1, 1]} : vector<8x128xf32> to vector<8x32xf32>
    %59 = arith.negf %58 : vector<8x32xf32>
    %60 = math.exp %59 : vector<8x32xf32>
    %cst_30 = arith.constant 1.000000e+00 : f32
    %61 = vector.broadcast %cst_30 : f32 to vector<8x32xf32>
    %62 = arith.addf %61, %60 : vector<8x32xf32>
    %63 = arith.divf %61, %62 : vector<8x32xf32>
    %64 = vector.extract_strided_slice %57 {offsets = [0, 32], sizes = [8, 32], strides = [1, 1]} : vector<8x128xf32> to vector<8x32xf32>
    %65 = arith.negf %64 : vector<8x32xf32>
    %66 = math.exp %65 : vector<8x32xf32>
    %cst_31 = arith.constant 1.000000e+00 : f32
    %67 = vector.broadcast %cst_31 : f32 to vector<8x32xf32>
    %68 = arith.addf %67, %66 : vector<8x32xf32>
    %69 = arith.divf %67, %68 : vector<8x32xf32>
    %70 = vector.extract_strided_slice %57 {offsets = [0, 64], sizes = [8, 32], strides = [1, 1]} : vector<8x128xf32> to vector<8x32xf32>
    %71 = math.tanh %70 : vector<8x32xf32>
    %72 = vector.extract_strided_slice %57 {offsets = [0, 96], sizes = [8, 32], strides = [1, 1]} : vector<8x128xf32> to vector<8x32xf32>
    %73 = arith.negf %72 : vector<8x32xf32>
    %74 = math.exp %73 : vector<8x32xf32>
    %cst_32 = arith.constant 1.000000e+00 : f32
    %75 = vector.broadcast %cst_32 : f32 to vector<8x32xf32>
    %76 = arith.addf %75, %74 : vector<8x32xf32>
    %77 = arith.divf %75, %76 : vector<8x32xf32>
    %78 = arith.mulf %69, %44 : vector<8x32xf32>
    %79 = arith.mulf %63, %71 : vector<8x32xf32>
    %80 = arith.addf %78, %79 : vector<8x32xf32>
    %81 = math.tanh %80 : vector<8x32xf32>
    %82 = arith.mulf %77, %81 : vector<8x32xf32>
    %c0_33 = arith.constant 0 : index
    %83 = arith.index_cast %52 : i32 to index
    %c0_34 = arith.constant 0 : index
    %c0_35 = arith.constant 0 : index
    %84 = vector.load %arg5[%c0_33, %83, %c0_34, %c0_35] : memref<1x8x8x32xf32, #tpu.memory_space<vmem>>, vector<1x1x8x32xf32>
    %85 = vector.shape_cast %84 : vector<1x1x8x32xf32> to vector<8x32xf32>
    %86 = vector.shape_cast %82 : vector<8x32xf32> to vector<1x1x8x32xf32>
    tpu.vector_store %arg5[%c0_33, %83, %c0_34, %c0_35], %86 {strides = array<i32>} : memref<1x8x8x32xf32, #tpu.memory_space<vmem>>, vector<1x1x8x32xf32>,
    %c0_i32_36 = arith.constant 0 : i32
    %87 = arith.cmpi eq, %arg0, %c0_i32_36 : i32
    %c2_i32 = arith.constant 2 : i32
    %c5_i32 = arith.constant 5 : i32
    %88 = arith.select %87, %c2_i32, %c5_i32 : i32
    %89 = arith.index_cast %88 : i32 to index
    %c0_37 = arith.constant 0 : index
    %c0_38 = arith.constant 0 : index
    %90 = vector.load %arg6[%89, %c0_37, %c0_38] : memref<8x8x128xf32, #tpu.memory_space<vmem>>, vector<1x8x128xf32>
    %91 = vector.shape_cast %90 : vector<1x8x128xf32> to vector<8x128xf32>
    %cst_39 = arith.constant dense<0.000000e+00> : vector<8x128xf32>
    %92 = tpu.matmul %82, %12, %cst_39 {dimension_numbers = #tpu.dot_dimension_numbers<[1], [0], [0], [1], [0, 0, 1, 1], [], []>} : vector<8x32xf32>, vector<32x128xf32>, vector<8x128xf32> -> vector<8x128xf32>
    %93 = arith.addf %91, %92 : vector<8x128xf32>
    %94 = vector.extract_strided_slice %93 {offsets = [0, 0], sizes = [8, 32], strides = [1, 1]} : vector<8x128xf32> to vector<8x32xf32>
    %95 = arith.negf %94 : vector<8x32xf32>
    %96 = math.exp %95 : vector<8x32xf32>
    %cst_40 = arith.constant 1.000000e+00 : f32
    %97 = vector.broadcast %cst_40 : f32 to vector<8x32xf32>
    %98 = arith.addf %97, %96 : vector<8x32xf32>
    %99 = arith.divf %97, %98 : vector<8x32xf32>
    %100 = vector.extract_strided_slice %93 {offsets = [0, 32], sizes = [8, 32], strides = [1, 1]} : vector<8x128xf32> to vector<8x32xf32>
    %101 = arith.negf %100 : vector<8x32xf32>
    %102 = math.exp %101 : vector<8x32xf32>
    %cst_41 = arith.constant 1.000000e+00 : f32
    %103 = vector.broadcast %cst_41 : f32 to vector<8x32xf32>
    %104 = arith.addf %103, %102 : vector<8x32xf32>
    %105 = arith.divf %103, %104 : vector<8x32xf32>
    %106 = vector.extract_strided_slice %93 {offsets = [0, 64], sizes = [8, 32], strides = [1, 1]} : vector<8x128xf32> to vector<8x32xf32>
    %107 = math.tanh %106 : vector<8x32xf32>
    %108 = vector.extract_strided_slice %93 {offsets = [0, 96], sizes = [8, 32], strides = [1, 1]} : vector<8x128xf32> to vector<8x32xf32>
    %109 = arith.negf %108 : vector<8x32xf32>
    %110 = math.exp %109 : vector<8x32xf32>
    %cst_42 = arith.constant 1.000000e+00 : f32
    %111 = vector.broadcast %cst_42 : f32 to vector<8x32xf32>
    %112 = arith.addf %111, %110 : vector<8x32xf32>
    %113 = arith.divf %111, %112 : vector<8x32xf32>
    %114 = arith.mulf %105, %80 : vector<8x32xf32>
    %115 = arith.mulf %99, %107 : vector<8x32xf32>
    %116 = arith.addf %114, %115 : vector<8x32xf32>
    %117 = math.tanh %116 : vector<8x32xf32>
    %118 = arith.mulf %113, %117 : vector<8x32xf32>
    %c0_43 = arith.constant 0 : index
    %119 = arith.index_cast %88 : i32 to index
    %c0_44 = arith.constant 0 : index
    %c0_45 = arith.constant 0 : index
    %120 = vector.load %arg5[%c0_43, %119, %c0_44, %c0_45] : memref<1x8x8x32xf32, #tpu.memory_space<vmem>>, vector<1x1x8x32xf32>
    %121 = vector.shape_cast %120 : vector<1x1x8x32xf32> to vector<8x32xf32>
    %122 = vector.shape_cast %118 : vector<8x32xf32> to vector<1x1x8x32xf32>
    tpu.vector_store %arg5[%c0_43, %119, %c0_44, %c0_45], %122 {strides = array<i32>} : memref<1x8x8x32xf32, #tpu.memory_space<vmem>>, vector<1x1x8x32xf32>,
    %c0_i32_46 = arith.constant 0 : i32
    %123 = arith.cmpi eq, %arg0, %c0_i32_46 : i32
    %c3_i32 = arith.constant 3 : i32
    %c4_i32 = arith.constant 4 : i32
    %124 = arith.select %123, %c3_i32, %c4_i32 : i32
    %125 = arith.index_cast %124 : i32 to index
    %c0_47 = arith.constant 0 : index
    %c0_48 = arith.constant 0 : index
    %126 = vector.load %arg6[%125, %c0_47, %c0_48] : memref<8x8x128xf32, #tpu.memory_space<vmem>>, vector<1x8x128xf32>
    %127 = vector.shape_cast %126 : vector<1x8x128xf32> to vector<8x128xf32>
    %cst_49 = arith.constant dense<0.000000e+00> : vector<8x128xf32>
    %128 = tpu.matmul %118, %12, %cst_49 {dimension_numbers = #tpu.dot_dimension_numbers<[1], [0], [0], [1], [0, 0, 1, 1], [], []>} : vector<8x32xf32>, vector<32x128xf32>, vector<8x128xf32> -> vector<8x128xf32>
    %129 = arith.addf %127, %128 : vector<8x128xf32>
    %130 = vector.extract_strided_slice %129 {offsets = [0, 0], sizes = [8, 32], strides = [1, 1]} : vector<8x128xf32> to vector<8x32xf32>
    %131 = arith.negf %130 : vector<8x32xf32>
    %132 = math.exp %131 : vector<8x32xf32>
    %cst_50 = arith.constant 1.000000e+00 : f32
    %133 = vector.broadcast %cst_50 : f32 to vector<8x32xf32>
    %134 = arith.addf %133, %132 : vector<8x32xf32>
    %135 = arith.divf %133, %134 : vector<8x32xf32>
    %136 = vector.extract_strided_slice %129 {offsets = [0, 32], sizes = [8, 32], strides = [1, 1]} : vector<8x128xf32> to vector<8x32xf32>
    %137 = arith.negf %136 : vector<8x32xf32>
    %138 = math.exp %137 : vector<8x32xf32>
    %cst_51 = arith.constant 1.000000e+00 : f32
    %139 = vector.broadcast %cst_51 : f32 to vector<8x32xf32>
    %140 = arith.addf %139, %138 : vector<8x32xf32>
    %141 = arith.divf %139, %140 : vector<8x32xf32>
    %142 = vector.extract_strided_slice %129 {offsets = [0, 64], sizes = [8, 32], strides = [1, 1]} : vector<8x128xf32> to vector<8x32xf32>
    %143 = math.tanh %142 : vector<8x32xf32>
    %144 = vector.extract_strided_slice %129 {offsets = [0, 96], sizes = [8, 32], strides = [1, 1]} : vector<8x128xf32> to vector<8x32xf32>
    %145 = arith.negf %144 : vector<8x32xf32>
    %146 = math.exp %145 : vector<8x32xf32>
    %cst_52 = arith.constant 1.000000e+00 : f32
    %147 = vector.broadcast %cst_52 : f32 to vector<8x32xf32>
    %148 = arith.addf %147, %146 : vector<8x32xf32>
    %149 = arith.divf %147, %148 : vector<8x32xf32>
    %150 = arith.mulf %141, %116 : vector<8x32xf32>
    %151 = arith.mulf %135, %143 : vector<8x32xf32>
    %152 = arith.addf %150, %151 : vector<8x32xf32>
    %153 = math.tanh %152 : vector<8x32xf32>
    %154 = arith.mulf %149, %153 : vector<8x32xf32>
    %c0_53 = arith.constant 0 : index
    %155 = arith.index_cast %124 : i32 to index
    %c0_54 = arith.constant 0 : index
    %c0_55 = arith.constant 0 : index
    %156 = vector.load %arg5[%c0_53, %155, %c0_54, %c0_55] : memref<1x8x8x32xf32, #tpu.memory_space<vmem>>, vector<1x1x8x32xf32>
    %157 = vector.shape_cast %156 : vector<1x1x8x32xf32> to vector<8x32xf32>
    %158 = vector.shape_cast %154 : vector<8x32xf32> to vector<1x1x8x32xf32>
    tpu.vector_store %arg5[%c0_53, %155, %c0_54, %c0_55], %158 {strides = array<i32>} : memref<1x8x8x32xf32, #tpu.memory_space<vmem>>, vector<1x1x8x32xf32>,
    %c0_i32_56 = arith.constant 0 : i32
    %159 = arith.cmpi eq, %arg0, %c0_i32_56 : i32
    %c4_i32_57 = arith.constant 4 : i32
    %c3_i32_58 = arith.constant 3 : i32
    %160 = arith.select %159, %c4_i32_57, %c3_i32_58 : i32
    %161 = arith.index_cast %160 : i32 to index
    %c0_59 = arith.constant 0 : index
    %c0_60 = arith.constant 0 : index
    %162 = vector.load %arg6[%161, %c0_59, %c0_60] : memref<8x8x128xf32, #tpu.memory_space<vmem>>, vector<1x8x128xf32>
    %163 = vector.shape_cast %162 : vector<1x8x128xf32> to vector<8x128xf32>
    %cst_61 = arith.constant dense<0.000000e+00> : vector<8x128xf32>
    %164 = tpu.matmul %154, %12, %cst_61 {dimension_numbers = #tpu.dot_dimension_numbers<[1], [0], [0], [1], [0, 0, 1, 1], [], []>} : vector<8x32xf32>, vector<32x128xf32>, vector<8x128xf32> -> vector<8x128xf32>
    %165 = arith.addf %163, %164 : vector<8x128xf32>
    %166 = vector.extract_strided_slice %165 {offsets = [0, 0], sizes = [8, 32], strides = [1, 1]} : vector<8x128xf32> to vector<8x32xf32>
    %167 = arith.negf %166 : vector<8x32xf32>
    %168 = math.exp %167 : vector<8x32xf32>
    %cst_62 = arith.constant 1.000000e+00 : f32
    %169 = vector.broadcast %cst_62 : f32 to vector<8x32xf32>
    %170 = arith.addf %169, %168 : vector<8x32xf32>
    %171 = arith.divf %169, %170 : vector<8x32xf32>
    %172 = vector.extract_strided_slice %165 {offsets = [0, 32], sizes = [8, 32], strides = [1, 1]} : vector<8x128xf32> to vector<8x32xf32>
    %173 = arith.negf %172 : vector<8x32xf32>
    %174 = math.exp %173 : vector<8x32xf32>
    %cst_63 = arith.constant 1.000000e+00 : f32
    %175 = vector.broadcast %cst_63 : f32 to vector<8x32xf32>
    %176 = arith.addf %175, %174 : vector<8x32xf32>
    %177 = arith.divf %175, %176 : vector<8x32xf32>
    %178 = vector.extract_strided_slice %165 {offsets = [0, 64], sizes = [8, 32], strides = [1, 1]} : vector<8x128xf32> to vector<8x32xf32>
    %179 = math.tanh %178 : vector<8x32xf32>
    %180 = vector.extract_strided_slice %165 {offsets = [0, 96], sizes = [8, 32], strides = [1, 1]} : vector<8x128xf32> to vector<8x32xf32>
    %181 = arith.negf %180 : vector<8x32xf32>
    %182 = math.exp %181 : vector<8x32xf32>
    %cst_64 = arith.constant 1.000000e+00 : f32
    %183 = vector.broadcast %cst_64 : f32 to vector<8x32xf32>
    %184 = arith.addf %183, %182 : vector<8x32xf32>
    %185 = arith.divf %183, %184 : vector<8x32xf32>
    %186 = arith.mulf %177, %152 : vector<8x32xf32>
    %187 = arith.mulf %171, %179 : vector<8x32xf32>
    %188 = arith.addf %186, %187 : vector<8x32xf32>
    %189 = math.tanh %188 : vector<8x32xf32>
    %190 = arith.mulf %185, %189 : vector<8x32xf32>
    %c0_65 = arith.constant 0 : index
    %191 = arith.index_cast %160 : i32 to index
    %c0_66 = arith.constant 0 : index
    %c0_67 = arith.constant 0 : index
    %192 = vector.load %arg5[%c0_65, %191, %c0_66, %c0_67] : memref<1x8x8x32xf32, #tpu.memory_space<vmem>>, vector<1x1x8x32xf32>
    %193 = vector.shape_cast %192 : vector<1x1x8x32xf32> to vector<8x32xf32>
    %194 = vector.shape_cast %190 : vector<8x32xf32> to vector<1x1x8x32xf32>
    tpu.vector_store %arg5[%c0_65, %191, %c0_66, %c0_67], %194 {strides = array<i32>} : memref<1x8x8x32xf32, #tpu.memory_space<vmem>>, vector<1x1x8x32xf32>,
    %c0_i32_68 = arith.constant 0 : i32
    %195 = arith.cmpi eq, %arg0, %c0_i32_68 : i32
    %c5_i32_69 = arith.constant 5 : i32
    %c2_i32_70 = arith.constant 2 : i32
    %196 = arith.select %195, %c5_i32_69, %c2_i32_70 : i32
    %197 = arith.index_cast %196 : i32 to index
    %c0_71 = arith.constant 0 : index
    %c0_72 = arith.constant 0 : index
    %198 = vector.load %arg6[%197, %c0_71, %c0_72] : memref<8x8x128xf32, #tpu.memory_space<vmem>>, vector<1x8x128xf32>
    %199 = vector.shape_cast %198 : vector<1x8x128xf32> to vector<8x128xf32>
    %cst_73 = arith.constant dense<0.000000e+00> : vector<8x128xf32>
    %200 = tpu.matmul %190, %12, %cst_73 {dimension_numbers = #tpu.dot_dimension_numbers<[1], [0], [0], [1], [0, 0, 1, 1], [], []>} : vector<8x32xf32>, vector<32x128xf32>, vector<8x128xf32> -> vector<8x128xf32>
    %201 = arith.addf %199, %200 : vector<8x128xf32>
    %202 = vector.extract_strided_slice %201 {offsets = [0, 0], sizes = [8, 32], strides = [1, 1]} : vector<8x128xf32> to vector<8x32xf32>
    %203 = arith.negf %202 : vector<8x32xf32>
    %204 = math.exp %203 : vector<8x32xf32>
    %cst_74 = arith.constant 1.000000e+00 : f32
    %205 = vector.broadcast %cst_74 : f32 to vector<8x32xf32>
    %206 = arith.addf %205, %204 : vector<8x32xf32>
    %207 = arith.divf %205, %206 : vector<8x32xf32>
    %208 = vector.extract_strided_slice %201 {offsets = [0, 32], sizes = [8, 32], strides = [1, 1]} : vector<8x128xf32> to vector<8x32xf32>
    %209 = arith.negf %208 : vector<8x32xf32>
    %210 = math.exp %209 : vector<8x32xf32>
    %cst_75 = arith.constant 1.000000e+00 : f32
    %211 = vector.broadcast %cst_75 : f32 to vector<8x32xf32>
    %212 = arith.addf %211, %210 : vector<8x32xf32>
    %213 = arith.divf %211, %212 : vector<8x32xf32>
    %214 = vector.extract_strided_slice %201 {offsets = [0, 64], sizes = [8, 32], strides = [1, 1]} : vector<8x128xf32> to vector<8x32xf32>
    %215 = math.tanh %214 : vector<8x32xf32>
    %216 = vector.extract_strided_slice %201 {offsets = [0, 96], sizes = [8, 32], strides = [1, 1]} : vector<8x128xf32> to vector<8x32xf32>
    %217 = arith.negf %216 : vector<8x32xf32>
    %218 = math.exp %217 : vector<8x32xf32>
    %cst_76 = arith.constant 1.000000e+00 : f32
    %219 = vector.broadcast %cst_76 : f32 to vector<8x32xf32>
    %220 = arith.addf %219, %218 : vector<8x32xf32>
    %221 = arith.divf %219, %220 : vector<8x32xf32>
    %222 = arith.mulf %213, %188 : vector<8x32xf32>
    %223 = arith.mulf %207, %215 : vector<8x32xf32>
    %224 = arith.addf %222, %223 : vector<8x32xf32>
    %225 = math.tanh %224 : vector<8x32xf32>
    %226 = arith.mulf %221, %225 : vector<8x32xf32>
    %c0_77 = arith.constant 0 : index
    %227 = arith.index_cast %196 : i32 to index
    %c0_78 = arith.constant 0 : index
    %c0_79 = arith.constant 0 : index
    %228 = vector.load %arg5[%c0_77, %227, %c0_78, %c0_79] : memref<1x8x8x32xf32, #tpu.memory_space<vmem>>, vector<1x1x8x32xf32>
    %229 = vector.shape_cast %228 : vector<1x1x8x32xf32> to vector<8x32xf32>
    %230 = vector.shape_cast %226 : vector<8x32xf32> to vector<1x1x8x32xf32>
    tpu.vector_store %arg5[%c0_77, %227, %c0_78, %c0_79], %230 {strides = array<i32>} : memref<1x8x8x32xf32, #tpu.memory_space<vmem>>, vector<1x1x8x32xf32>,
    %c0_i32_80 = arith.constant 0 : i32
    %231 = arith.cmpi eq, %arg0, %c0_i32_80 : i32
    %c6_i32_81 = arith.constant 6 : i32
    %c1_i32_82 = arith.constant 1 : i32
    %232 = arith.select %231, %c6_i32_81, %c1_i32_82 : i32
    %233 = arith.index_cast %232 : i32 to index
    %c0_83 = arith.constant 0 : index
    %c0_84 = arith.constant 0 : index
    %234 = vector.load %arg6[%233, %c0_83, %c0_84] : memref<8x8x128xf32, #tpu.memory_space<vmem>>, vector<1x8x128xf32>
    %235 = vector.shape_cast %234 : vector<1x8x128xf32> to vector<8x128xf32>
    %cst_85 = arith.constant dense<0.000000e+00> : vector<8x128xf32>
    %236 = tpu.matmul %226, %12, %cst_85 {dimension_numbers = #tpu.dot_dimension_numbers<[1], [0], [0], [1], [0, 0, 1, 1], [], []>} : vector<8x32xf32>, vector<32x128xf32>, vector<8x128xf32> -> vector<8x128xf32>
    %237 = arith.addf %235, %236 : vector<8x128xf32>
    %238 = vector.extract_strided_slice %237 {offsets = [0, 0], sizes = [8, 32], strides = [1, 1]} : vector<8x128xf32> to vector<8x32xf32>
    %239 = arith.negf %238 : vector<8x32xf32>
    %240 = math.exp %239 : vector<8x32xf32>
    %cst_86 = arith.constant 1.000000e+00 : f32
    %241 = vector.broadcast %cst_86 : f32 to vector<8x32xf32>
    %242 = arith.addf %241, %240 : vector<8x32xf32>
    %243 = arith.divf %241, %242 : vector<8x32xf32>
    %244 = vector.extract_strided_slice %237 {offsets = [0, 32], sizes = [8, 32], strides = [1, 1]} : vector<8x128xf32> to vector<8x32xf32>
    %245 = arith.negf %244 : vector<8x32xf32>
    %246 = math.exp %245 : vector<8x32xf32>
    %cst_87 = arith.constant 1.000000e+00 : f32
    %247 = vector.broadcast %cst_87 : f32 to vector<8x32xf32>
    %248 = arith.addf %247, %246 : vector<8x32xf32>
    %249 = arith.divf %247, %248 : vector<8x32xf32>
    %250 = vector.extract_strided_slice %237 {offsets = [0, 64], sizes = [8, 32], strides = [1, 1]} : vector<8x128xf32> to vector<8x32xf32>
    %251 = math.tanh %250 : vector<8x32xf32>
    %252 = vector.extract_strided_slice %237 {offsets = [0, 96], sizes = [8, 32], strides = [1, 1]} : vector<8x128xf32> to vector<8x32xf32>
    %253 = arith.negf %252 : vector<8x32xf32>
    %254 = math.exp %253 : vector<8x32xf32>
    %cst_88 = arith.constant 1.000000e+00 : f32
    %255 = vector.broadcast %cst_88 : f32 to vector<8x32xf32>
    %256 = arith.addf %255, %254 : vector<8x32xf32>
    %257 = arith.divf %255, %256 : vector<8x32xf32>
    %258 = arith.mulf %249, %224 : vector<8x32xf32>
    %259 = arith.mulf %243, %251 : vector<8x32xf32>
    %260 = arith.addf %258, %259 : vector<8x32xf32>
    %261 = math.tanh %260 : vector<8x32xf32>
    %262 = arith.mulf %257, %261 : vector<8x32xf32>
    %c0_89 = arith.constant 0 : index
    %263 = arith.index_cast %232 : i32 to index
    %c0_90 = arith.constant 0 : index
    %c0_91 = arith.constant 0 : index
    %264 = vector.load %arg5[%c0_89, %263, %c0_90, %c0_91] : memref<1x8x8x32xf32, #tpu.memory_space<vmem>>, vector<1x1x8x32xf32>
    %265 = vector.shape_cast %264 : vector<1x1x8x32xf32> to vector<8x32xf32>
    %266 = vector.shape_cast %262 : vector<8x32xf32> to vector<1x1x8x32xf32>
    tpu.vector_store %arg5[%c0_89, %263, %c0_90, %c0_91], %266 {strides = array<i32>} : memref<1x8x8x32xf32, #tpu.memory_space<vmem>>, vector<1x1x8x32xf32>,
    %c0_i32_92 = arith.constant 0 : i32
    %267 = arith.cmpi eq, %arg0, %c0_i32_92 : i32
    %c7_i32_93 = arith.constant 7 : i32
    %c0_i32_94 = arith.constant 0 : i32
    %268 = arith.select %267, %c7_i32_93, %c0_i32_94 : i32
    %269 = arith.index_cast %268 : i32 to index
    %c0_95 = arith.constant 0 : index
    %c0_96 = arith.constant 0 : index
    %270 = vector.load %arg6[%269, %c0_95, %c0_96] : memref<8x8x128xf32, #tpu.memory_space<vmem>>, vector<1x8x128xf32>
    %271 = vector.shape_cast %270 : vector<1x8x128xf32> to vector<8x128xf32>
    %cst_97 = arith.constant dense<0.000000e+00> : vector<8x128xf32>
    %272 = tpu.matmul %262, %12, %cst_97 {dimension_numbers = #tpu.dot_dimension_numbers<[1], [0], [0], [1], [0, 0, 1, 1], [], []>} : vector<8x32xf32>, vector<32x128xf32>, vector<8x128xf32> -> vector<8x128xf32>
    %273 = arith.addf %271, %272 : vector<8x128xf32>
    %274 = vector.extract_strided_slice %273 {offsets = [0, 0], sizes = [8, 32], strides = [1, 1]} : vector<8x128xf32> to vector<8x32xf32>
    %275 = arith.negf %274 : vector<8x32xf32>
    %276 = math.exp %275 : vector<8x32xf32>
    %cst_98 = arith.constant 1.000000e+00 : f32
    %277 = vector.broadcast %cst_98 : f32 to vector<8x32xf32>
    %278 = arith.addf %277, %276 : vector<8x32xf32>
    %279 = arith.divf %277, %278 : vector<8x32xf32>
    %280 = vector.extract_strided_slice %273 {offsets = [0, 32], sizes = [8, 32], strides = [1, 1]} : vector<8x128xf32> to vector<8x32xf32>
    %281 = arith.negf %280 : vector<8x32xf32>
    %282 = math.exp %281 : vector<8x32xf32>
    %cst_99 = arith.constant 1.000000e+00 : f32
    %283 = vector.broadcast %cst_99 : f32 to vector<8x32xf32>
    %284 = arith.addf %283, %282 : vector<8x32xf32>
    %285 = arith.divf %283, %284 : vector<8x32xf32>
    %286 = vector.extract_strided_slice %273 {offsets = [0, 64], sizes = [8, 32], strides = [1, 1]} : vector<8x128xf32> to vector<8x32xf32>
    %287 = math.tanh %286 : vector<8x32xf32>
    %288 = vector.extract_strided_slice %273 {offsets = [0, 96], sizes = [8, 32], strides = [1, 1]} : vector<8x128xf32> to vector<8x32xf32>
    %289 = arith.negf %288 : vector<8x32xf32>
    %290 = math.exp %289 : vector<8x32xf32>
    %cst_100 = arith.constant 1.000000e+00 : f32
    %291 = vector.broadcast %cst_100 : f32 to vector<8x32xf32>
    %292 = arith.addf %291, %290 : vector<8x32xf32>
    %293 = arith.divf %291, %292 : vector<8x32xf32>
    %294 = arith.mulf %285, %260 : vector<8x32xf32>
    %295 = arith.mulf %279, %287 : vector<8x32xf32>
    %296 = arith.addf %294, %295 : vector<8x32xf32>
    %297 = math.tanh %296 : vector<8x32xf32>
    %298 = arith.mulf %293, %297 : vector<8x32xf32>
    %c0_101 = arith.constant 0 : index
    %299 = arith.index_cast %268 : i32 to index
    %c0_102 = arith.constant 0 : index
    %c0_103 = arith.constant 0 : index
    %300 = vector.load %arg5[%c0_101, %299, %c0_102, %c0_103] : memref<1x8x8x32xf32, #tpu.memory_space<vmem>>, vector<1x1x8x32xf32>
    %301 = vector.shape_cast %300 : vector<1x1x8x32xf32> to vector<8x32xf32>
    %302 = vector.shape_cast %298 : vector<8x32xf32> to vector<1x1x8x32xf32>
    tpu.vector_store %arg5[%c0_101, %299, %c0_102, %c0_103], %302 {strides = array<i32>} : memref<1x8x8x32xf32, #tpu.memory_space<vmem>>, vector<1x1x8x32xf32>,
    return
  }
  func.func @transform_0(%arg0: i32) -> (i32, i32, i32) {
    %c0_i32 = arith.constant 0 : i32
    %c0_i32_0 = arith.constant 0 : i32
    %c0_i32_1 = arith.constant 0 : i32
    %c0_i32_2 = arith.constant 0 : i32
    return %c0_i32, %c0_i32_0, %c0_i32_1 : i32, i32, i32
  }
  func.func @transform_1(%arg0: i32) -> (i32, i32, i32) {
    %c0_i32 = arith.constant 0 : i32
    %c0_i32_0 = arith.constant 0 : i32
    %c0_i32_1 = arith.constant 0 : i32
    return %arg0, %c0_i32, %c0_i32_0 : i32, i32, i32
  }
  func.func @transform_2(%arg0: i32) -> (i32, i32, i32) {
    %c0_i32 = arith.constant 0 : i32
    %c0_i32_0 = arith.constant 0 : i32
    %c0_i32_1 = arith.constant 0 : i32
    return %arg0, %c0_i32, %c0_i32_0 : i32, i32, i32
  }
  func.func @transform_3(%arg0: i32) -> (i32, i32, i32) {
    %c0_i32 = arith.constant 0 : i32
    %c0_i32_0 = arith.constant 0 : i32
    %c0_i32_1 = arith.constant 0 : i32
    return %arg0, %c0_i32, %c0_i32_0 : i32, i32, i32
  }
  func.func @transform_4(%arg0: i32) -> (i32, i32, i32, i32) {
    %c0_i32 = arith.constant 0 : i32
    %c0_i32_0 = arith.constant 0 : i32
    %c0_i32_1 = arith.constant 0 : i32
    %c0_i32_2 = arith.constant 0 : i32
    return %arg0, %c0_i32, %c0_i32_0, %c0_i32_1 : i32, i32, i32, i32
  }
}

module attributes {stable_mosaic.version = 11 : i64} {
  func.func @_fc_softmax_kernel(%arg0: i32, %arg1: memref<8x128xf32, #tpu.memory_space<vmem>>, %arg2: memref<128x128xf32, #tpu.memory_space<vmem>>, %arg3: memref<1x128xf32, #tpu.memory_space<vmem>>, %arg4: memref<8x128xf32, #tpu.memory_space<vmem>>) attributes {dimension_semantics = [#tpu.dimension_semantics<arbitrary>], iteration_bounds = array<i64: 1>, scalar_prefetch = 0 : i64, scratch_operands = 0 : i64, tpu.core_type = #tpu.core_type<tc>, window_params = [{pipeline_mode = #tpu.pipeline_mode<synchronous>, transform_indices = @transform_0, window_bounds = array<i64: 8, 128>}, {pipeline_mode = #tpu.pipeline_mode<synchronous>, transform_indices = @transform_1, window_bounds = array<i64: 128, 128>}, {pipeline_mode = #tpu.pipeline_mode<synchronous>, transform_indices = @transform_2, window_bounds = array<i64: 1, 128>}, {pipeline_mode = #tpu.pipeline_mode<synchronous>, transform_indices = @transform_3, window_bounds = array<i64: 8, 128>}]} {
    %c0 = arith.constant 0 : index
    %c0_0 = arith.constant 0 : index
    %0 = vector.load %arg1[%c0, %c0_0] : memref<8x128xf32, #tpu.memory_space<vmem>>, vector<8x128xf32>
    %c0_1 = arith.constant 0 : index
    %c0_2 = arith.constant 0 : index
    %1 = vector.load %arg2[%c0_1, %c0_2] : memref<128x128xf32, #tpu.memory_space<vmem>>, vector<128x128xf32>
    %cst = arith.constant dense<0.000000e+00> : vector<8x128xf32>
    %2 = tpu.matmul %0, %1, %cst {dimension_numbers = #tpu.dot_dimension_numbers<[1], [0], [0], [1], [0, 0, 1, 1], [], []>} : vector<8x128xf32>, vector<128x128xf32>, vector<8x128xf32> -> vector<8x128xf32>
    %c0_3 = arith.constant 0 : index
    %c0_4 = arith.constant 0 : index
    %3 = vector.load %arg3[%c0_3, %c0_4] : memref<1x128xf32, #tpu.memory_space<vmem>>, vector<1x128xf32>
    %4 = vector.broadcast %3 : vector<1x128xf32> to vector<8x128xf32>
    %5 = arith.addf %2, %4 : vector<8x128xf32>
    %cst_5 = arith.constant dense<0xFF800000> : vector<8xf32>
    %6 = vector.multi_reduction <maximumf>, %5, %cst_5 [1] : vector<8x128xf32> to vector<8xf32>
    %cst_6 = arith.constant 0xFF800000 : f32
    %7 = vector.broadcast %cst_6 : f32 to vector<8xf32>
    %8 = arith.maximumf %7, %6 : vector<8xf32>
    %9 = vector.shape_cast %8 : vector<8xf32> to vector<8x1xf32>
    %10 = vector.broadcast %9 : vector<8x1xf32> to vector<8x128xf32>
    %11 = arith.subf %5, %10 : vector<8x128xf32>
    %12 = math.exp %11 : vector<8x128xf32>
    %cst_7 = arith.constant dense<0.000000e+00> : vector<8xf32>
    %13 = vector.multi_reduction <add>, %12, %cst_7 [1] : vector<8x128xf32> to vector<8xf32>
    %14 = vector.shape_cast %13 : vector<8xf32> to vector<8x1xf32>
    %15 = vector.broadcast %14 : vector<8x1xf32> to vector<8x128xf32>
    %16 = arith.divf %12, %15 : vector<8x128xf32>
    %c0_8 = arith.constant 0 : index
    %c0_9 = arith.constant 0 : index
    %17 = vector.load %arg4[%c0_8, %c0_9] : memref<8x128xf32, #tpu.memory_space<vmem>>, vector<8x128xf32>
    tpu.vector_store %arg4[%c0_8, %c0_9], %16 {strides = array<i32>} : memref<8x128xf32, #tpu.memory_space<vmem>>, vector<8x128xf32>,
    return
  }
  func.func @transform_0(%arg0: i32) -> (i32, i32) {
    %c0_i32 = arith.constant 0 : i32
    %c0_i32_0 = arith.constant 0 : i32
    %c0_i32_1 = arith.constant 0 : i32
    return %c0_i32, %c0_i32_0 : i32, i32
  }
  func.func @transform_1(%arg0: i32) -> (i32, i32) {
    %c0_i32 = arith.constant 0 : i32
    %c0_i32_0 = arith.constant 0 : i32
    %c0_i32_1 = arith.constant 0 : i32
    return %c0_i32, %c0_i32_0 : i32, i32
  }
  func.func @transform_2(%arg0: i32) -> (i32, i32) {
    %c0_i32 = arith.constant 0 : i32
    %c0_i32_0 = arith.constant 0 : i32
    %c0_i32_1 = arith.constant 0 : i32
    return %c0_i32, %c0_i32_0 : i32, i32
  }
  func.func @transform_3(%arg0: i32) -> (i32, i32) {
    %c0_i32 = arith.constant 0 : i32
    %c0_i32_0 = arith.constant 0 : i32
    %c0_i32_1 = arith.constant 0 : i32
    return %c0_i32, %c0_i32_0 : i32, i32
  }
}

</mosaic_0001>

<bundles_post_ra>
// kernel: my_lstm_forward.5
= control target key start
LH: loop header
LB: loop body
LE: loop exit
PB: predicated region body
PF: predicated region fallthrough
CT: control target
= control target key end

     0   :  { %v206_v0 = vmov 0.0|0.0   ;;  %vm207_vm0 = vmmov 0   ;;  %v208_v4 = vmov 0.0   ;;  %s286_s1 = inlined_call_operand.vmem [shape: f32[128,128], index: 1, kind: input, shape index: {}]   ;;  %s287_s0 = inlined_call_operand.vmem [shape: f32[8,128], index: 0, kind: input, shape index: {}]   ;;  %s288_s2 = inlined_call_operand.vmem [shape: f32[1,128], index: 2, kind: input, shape index: {}]   ;;  %s289_s3 = inlined_call_operand.vmem [shape: f32[8,128], index: 3, kind: output, shape index: {}]  }
   0x1   :  { %175 = vmatprep.subr.bf16.mxu0 %v206_v0  ;;  %v15_v1 = vld [vmem:[%s286_s1] sm:$0xff]  ;;  %v16_v2 = vld [vmem:[%s286_s1 + $0x8] sm:$0xff]  ;;  %v17_v3 = vld [vmem:[%s286_s1 + $0x10] sm:$0xff]  ;;  %172 = vmatprep.mubr.msk.f32.mxu0 %vm207_vm0, %v208_v4 }
   0x2   :  { %v176_v5 = vpack.c.bf16 %v16_v2, %v15_v1  ;;  %v18_v6 = vld [vmem:[%s286_s1 + $0x18] sm:$0xff]  ;;  %v19_v8 = vld [vmem:[%s286_s1 + $0x20] sm:$0xff]  ;;  %v20_v9 = vld [vmem:[%s286_s1 + $0x28] sm:$0xff] }
   0x3   :  { %v179_v7 = vpack.c.bf16 %v18_v6, %v17_v3  ;;  %v182_v10 = vpack.c.bf16 %v20_v9, %v19_v8  ;;  %v21_v11 = vld [vmem:[%s286_s1 + $0x30] sm:$0xff]  ;;  %v22_v12 = vld [vmem:[%s286_s1 + $0x38] sm:$0xff]  ;;  %v23_v14 = vld [vmem:[%s286_s1 + $0x40] sm:$0xff] }
   0x4   :  { %177 = vmatpush3.bf16.msra.mxu0 %v176_v5  ;;  %v185_v13 = vpack.c.bf16 %v22_v12, %v21_v11  ;;  %v24_v15 = vld [vmem:[%s286_s1 + $0x48] sm:$0xff]  ;;  %v25_v17 = vld [vmem:[%s286_s1 + $0x50] sm:$0xff]  ;;  %v26_v18 = vld [vmem:[%s286_s1 + $0x58] sm:$0xff] }
   0x5   :  { %178 = vmatprep.subr.bf16.mxu0 %v206_v0  ;;  %v188_v16 = vpack.c.bf16 %v24_v15, %v23_v14  ;;  %v191_v19 = vpack.c.bf16 %v26_v18, %v25_v17  ;;  %v27_v20 = vld [vmem:[%s286_s1 + $0x60] sm:$0xff]  ;;  %v28_v21 = vld [vmem:[%s286_s1 + $0x68] sm:$0xff]  ;;  %v29_v23 = vld [vmem:[%s286_s1 + $0x70] sm:$0xff] }
   0x6   :  { %v194_v22 = vpack.c.bf16 %v28_v21, %v27_v20  ;;  %v30_v24 = vld [vmem:[%s286_s1 + $0x78] sm:$0xff]  ;;  %v14_v26 = vld [vmem:[%s287_s0] sm:$0xff] }
   0x7   :  { %v197_v25 = vpack.c.bf16 %v30_v24, %v29_v23  ;;  %v122_v27 = vld [vmem:[%s288_s2] ss:$0 sm:$0xff] }
   0x8   :  { %180 = vmatpush3.bf16.msra.mxu0 %v179_v7 }
   0x9   :  { %181 = vmatprep.subr.bf16.mxu0 %v206_v0 }
   0xc   :  { %183 = vmatpush3.bf16.msra.mxu0 %v182_v10 }
   0xd   :  { %184 = vmatprep.subr.bf16.mxu0 %v206_v0 }
  0x10   :  { %186 = vmatpush3.bf16.msra.mxu0 %v185_v13 }
  0x11   :  { %187 = vmatprep.subr.bf16.mxu0 %v206_v0 }
  0x14   :  { %189 = vmatpush3.bf16.msra.mxu0 %v188_v16 }
  0x15   :  { %190 = vmatprep.subr.bf16.mxu0 %v206_v0 }
  0x18   :  { %192 = vmatpush3.bf16.msra.mxu0 %v191_v19 }
  0x19   :  { %193 = vmatprep.subr.bf16.mxu0 %v206_v0 }
  0x1c   :  { %195 = vmatpush3.bf16.msra.mxu0 %v194_v22 }
  0x1d   :  { %196 = vmatprep.subr.bf16.mxu0 %v206_v0 }
  0x20   :  { %198 = vmatpush3.bf16.msra.mxu0 %v197_v25 }
  0x23   :  { %173 = vmatmul.mubr.f32.vlgmr.msra.gmra.mrb[0].mxu0 %v14_v26 }
  0xf6   :  { %v104_v28 = vpop.f32.mrb[0].mxu0 }
  0xf7   :  { %v105_v29 = vadd.f32 %v122_v27, %v104_v28  ;;  %v174_v30 = vpop.f32.mrb[1].mxu0 }
  0xf9   :  { %108 = vmax.xlane.f32.xlu0 %v105_v29 }
 0x186   :  { %v109_v31 = vpop.xlane.xlu0 %108 }
 0x187   :  { %v110_v32 = vsub.f32 %v105_v29, %v109_v31 }
 0x189   :  { %v111_v33 = vmul.f32 1.442695, %v110_v32 }
 0x18b   :  { %202 = vpow2.f32 %v111_v33 }
 0x195   :  { %v203_v34 = vpop.eup %202 }
 0x196   :  { %113 = vadd.xlane.f32.xlu0 %v203_v34 }
 0x223   :  { %v114_v35 = vpop.xlane.xlu0 %113 }
 0x224   :  { %204 = vrcp.f32 %v114_v35 }
 0x22e   :  { %v205_v36 = vpop.eup %204 }
 0x22f   :  { %v116_v37 = vmul.f32 %v205_v36, %v203_v34 }
 0x231   :  { %117 = vst [vmem:[%s289_s3] sm:$0xff] %v116_v37 }

// kernel: my_lstm_forward.3
= control target key start
LH: loop header
LB: loop body
LE: loop exit
PB: predicated region body
PF: predicated region fallthrough
CT: control target
= control target key end

     0   :  { %s1727_s15 = smov 0   ;;  %s1947_s0 = inlined_call_operand.vmem [shape: f32[8,8,16], index: 0, kind: input, shape index: {}]   ;;  %s1948_s1 = inlined_call_operand.vmem [shape: f32[2,16,128], index: 1, kind: input, shape index: {}]   ;;  %s1949_s2 = inlined_call_operand.vmem [shape: f32[2,32,128], index: 2, kind: input, shape index: {}]   ;;  %s1950_s3 = inlined_call_operand.vmem [shape: f32[2,1,128], index: 3, kind: input, shape index: {}]   ;;  %s1951_s4 = inlined_call_operand.vmem [shape: f32[2,8,8,32], index: 4, kind: output, shape index: {}]  }
   0x1 LB: > { %s1733_s16 = sadd.s32 4294967295, %s1695_s15   ;;  %p1362_p0 = scmp.ge.s32.totalorder %s1695_s15, 1  ;;  %s1695_s15 = sphi %s1727_s15, %s14_s15  }
   0x2   : > { %p180_p1 = scmp.lt.s32.totalorder %s1695_s15, 3 }
   0x4   : > { %p181_p2 = pnand %p1362_p0, %p180_p1 }
   0x5   : > { %p214_p3 = scmp.lt.s32.totalorder (!%p181_p2), %s1733_s16, 1  ;;  %v232_v0 = vld [vmem:[%s1947_s0] sm:$0xff] (!%p181_p2)  ;;  %vm249_vm0 = vcmask (!%p181_p2), 130048   ;;  %v1697_v1 = vmov (!%p181_p2), 0.0|0.0   ;;  %vm1698_vm1 = vmmov (!%p181_p2), 0   ;;  %v1699_v2 = vmov (!%p181_p2), 0.0  }
   0x6   : > { %184 = sbr.rel (%p181_p2) target bundleno = 5664 (0x1620), region = 36  ;;  %1460 = vmatprep.mubr.msk.f32.mxu0 (!%p181_p2), %vm249_vm0, %v232_v0  ;;  %1564 = vmatprep.subr.bf16.mxu1 (!%p181_p2), %v1697_v1  ;;  %v233_v12 = vld [vmem:[%s1947_s0 + $0x8] sm:$0xff] (!%p181_p2)  ;;  %v234_v13 = vld [vmem:[%s1947_s0 + $0x10] sm:$0xff] (!%p181_p2)  ;;  %v235_v14 = vld [vmem:[%s1947_s0 + $0x18] sm:$0xff] (!%p181_p2)  ;;  %p391_p4 = scmp.eq.s32.totalorder (!%p181_p2), %s1733_s16, 0  ;;  %vm396_vm2 = vcmask (!%p181_p2), 261120  }
   0x7   : > { %1480 = vmatprep.mubr.msk.f32.mxu1 (!%p181_p2), %vm1698_vm1, %v1699_v2  ;;  %v236_v15 = vld [vmem:[%s1947_s0 + $0x20] sm:$0xff] (!%p181_p2)  ;;  %v237_v16 = vld [vmem:[%s1947_s0 + $0x28] sm:$0xff] (!%p181_p2)  ;;  %v238_v17 = vld [vmem:[%s1947_s0 + $0x30] sm:$0xff] (!%p181_p2)  ;;  %s1700_s25 = smov (!%p181_p2), 64   ;;  %s1701_s26 = smov (!%p181_p2), 32  }
   0x8   : > { %v239_v18 = vld [vmem:[%s1947_s0 + $0x38] sm:$0xff] (!%p181_p2) }
   0xd   : > { %s1744_s19 = scalar_select %p214_p3, %s1733_s16, 1 }
   0xe   : > { %s1813_s22 = scalar_select %p391_p4, 0, 7 }
   0xf   : > { %s1403_s20 = sshll.u32 %s1744_s19, 4  ;;  %s1404_s21 = sshll.u32 %s1744_s19, 5 }
  0x10   : > { %s218_s24 = scalar_lea.vmem %s1948_s1, %s1403_s20  ;;  %s223_s27 = scalar_lea.vmem %s1949_s2, %s1404_s21 }
  0x11   : > { %v240_v3 = vld [vmem:[%s218_s24] sm:$0xff]  ;;  %v241_v4 = vld [vmem:[%s218_s24 + $0x8] sm:$0xff]  ;;  %v389_v8 = vld [vmem:[%s223_s27 + $0x10] sm:$0xff]  ;;  %s226_s21 = scalar_lea.vmem %s1950_s3, %s1744_s19  ;;  %s1378_s23 = sshll.u32 %s1813_s22, 3 }
  0x12   : > { %v387_v5 = vld [vmem:[%s223_s27] sm:$0xff]  ;;  %v1560_v6 = vpack.c.bf16 %v241_v4, %v240_v3  ;;  %v388_v7 = vld [vmem:[%s223_s27 + $0x8] sm:$0xff]  ;;  %v390_v9 = vld [vmem:[%s223_s27 + $0x18] sm:$0xff]  ;;  %s394_s24 = scalar_lea.vmem [#allocation2], %s1378_s23  ;;  %s1405_s27 = sshll.u32 %s1744_s19, 6 }
  0x13   : > { %v1756_v10 = vpack.c.bf16 %v388_v7, %v387_v5  ;;  %v1758_v11 = vpack.c.bf16 %v390_v9, %v389_v8  ;;  %v1369_v19 = vld [vmem:[%s226_s21] ss:$0 sm:$0xff]  ;;  %s1826_s30 = scalar_lea.vmem %s1951_s4, %s1405_s27 }
  0x14   : > { %1561 = vmatprep.subr.bf16.mxu0 %v1560_v6  ;;  %s499_s5 = scalar_lea.vmem %s1826_s30, %s1378_s23 }
  0x15   : > { %1563 = vmatpush3.bf16.msra.mxu0 %v1560_v6  ;;  %1566 = vmatpush3.bf16.msra.mxu1 %v1756_v10  ;;  %s1841_s19 = scalar_select %p391_p4, 1, 6 }
  0x16   : > { %1567 = vmatprep.subr.bf16.mxu1 %v1697_v1  ;;  %1576 = vmatprep.subr.bf16.mxu0 %v1697_v1  ;;  %s1859_s9 = scalar_select %p391_p4, 2, 5 }
  0x17   : > { %s1380_s6 = sshll.u32 %s1841_s19, 3 }
  0x18   : > { %1461 = vmatmul.mubr.msk.f32.vlgmr.msra.gmra.mrb[0].mxu0 %vm249_vm0, %v233_v12  ;;  %s503_s7 = scalar_lea.vmem [#allocation2], %s1380_s6  ;;  %s606_s8 = scalar_lea.vmem %s1826_s30, %s1380_s6 }
  0x19   : > { %1463 = vmatprep.mubr.msk.f32.mxu0 %vm249_vm0, %v234_v13  ;;  %1569 = vmatpush3.bf16.msra.mxu1 %v1758_v11  ;;  %s1383_s10 = sshll.u32 %s1859_s9, 3 }
  0x1a   : > { %1570 = vmatprep.subr.bf16.mxu1 %v1697_v1  ;;  %1578 = vmatpush3.bf16.msra.mxu0 %v1756_v10  ;;  %s610_s11 = scalar_lea.vmem [#allocation2], %s1383_s10  ;;  %s713_s12 = scalar_lea.vmem %s1826_s30, %s1383_s10 }
  0x1b   : > { %1579 = vmatprep.subr.bf16.mxu0 %v1697_v1  ;;  %s1877_s13 = scalar_select %p391_p4, 3, 4 }
  0x1c   : > { %1464 = vmatmul.mubr.msk.f32.gmra.mrb[2].mxu0 %vm249_vm0, %v235_v14  ;;  %1481 = vmatmul.mubr.f32.vlgmr.msra.gmra.mrb[0].mxu1 %v1699_v2  ;;  %s1894_s20 = scalar_select %p391_p4, 4, 3 }
  0x1d   : > { %1466 = vmatprep.mubr.msk.f32.mxu0 %vm249_vm0, %v236_v15  ;;  %1572 = vmatpush3.bf16.msra.mxu1 %v1756_v10  ;;  %s1386_s14 = sshll.u32 %s1877_s13, 3 }
  0x1e   : > { %1573 = vmatprep.subr.bf16.mxu1 %v1697_v1  ;;  %1491 = vmatprep.mubr.msk.f32.mxu1 %vm1698_vm1, %v1699_v2  ;;  %s717_s17 = scalar_lea.vmem [#allocation2], %s1386_s14  ;;  %s820_s18 = scalar_lea.vmem %s1826_s30, %s1386_s14 }
  0x1f   : > { %1581 = vmatpush3.bf16.msra.mxu0 %v1758_v11  ;;  %s1389_s21 = sshll.u32 %s1894_s20, 3 }
  0x20   : > { %1467 = vmatmul.mubr.msk.f32.gmra.mrb[4].mxu0 %vm249_vm0, %v237_v16  ;;  %1588 = vmatprep.subr.bf16.mxu0 %v1697_v1  ;;  %s824_s22 = scalar_lea.vmem [#allocation2], %s1389_s21  ;;  %s927_s23 = scalar_lea.vmem %s1826_s30, %s1389_s21 }
  0x21   : > { %1469 = vmatprep.mubr.msk.f32.mxu0 %vm249_vm0, %v238_v17  ;;  %1575 = vmatpush3.bf16.msra.mxu1 %v1758_v11 }
  0x22   : > { %1582 = vmatprep.subr.bf16.mxu1 %v1697_v1 }
  0x24   : > { %1470 = vmatmul.mubr.msk.f32.gmra.mrb[6].mxu0 %vm249_vm0, %v239_v18 }
  0x25   : > { %1502 = vmatprep.mubr.msk.f32.mxu0 %vm1698_vm1, %v1699_v2 }
  0xeb   : > { %v1462_v20 = vpop.f32.mrb[0].mxu0 }
  0xec   : > { %v346_v21 = vadd.f32 %v1462_v20, %v1369_v19  ;;  %v340_v22 = vpop.f32.mrb[1].mxu0 }
  0xed   : > { %v341_v23 = vadd.f32 %v1369_v19, %v340_v22 }
  0xee   : > { %380 = vst [vmem:[#allocation2 + $0x8] sm:$0xff] %v346_v21 }
  0xef   : > { %379 = vst [vmem:[#allocation2] sm:$0xff] %v341_v23  ;;  %v1465_v24 = vpop.f32.mrb[2].mxu0  ;;  %v466_v25 = vpop.f32.mrb[0].mxu1 }
  0xf0   : > { %v356_v26 = vadd.f32 %v1465_v24, %v1369_v19  ;;  %v350_v27 = vpop.f32.mrb[3].mxu0  ;;  %v1482_v28 = vpop.f32.mrb[1].mxu1 }
  0xf1   : > { %v351_v29 = vadd.f32 %v1369_v19, %v350_v27 }
  0xf2   : > { %382 = vst [vmem:[#allocation2 + $0x18] sm:$0xff] %v356_v26 }
  0xf3   : > { %381 = vst [vmem:[#allocation2 + $0x10] sm:$0xff] %v351_v29  ;;  %v1468_v30 = vpop.f32.mrb[4].mxu0 }
  0xf4   : > { %v366_v31 = vadd.f32 %v1468_v30, %v1369_v19  ;;  %v360_v32 = vpop.f32.mrb[5].mxu0 }
  0xf5   : > { %v361_v33 = vadd.f32 %v1369_v19, %v360_v32 }
  0xf6   : > { %384 = vst [vmem:[#allocation2 + $0x28] sm:$0xff] %v366_v31 }
  0xf7   : > { %383 = vst [vmem:[#allocation2 + $0x20] sm:$0xff] %v361_v33  ;;  %v1471_v34 = vpop.f32.mrb[6].mxu0 }
  0xf8   : > { %v376_v35 = vadd.f32 %v1471_v34, %v1369_v19  ;;  %v370_v36 = vpop.f32.mrb[7].mxu0 }
  0xf9   : > { %v371_v37 = vadd.f32 %v1369_v19, %v370_v36 }
  0xfa   : > { %386 = vst [vmem:[#allocation2 + $0x38] sm:$0xff] %v376_v35 }
  0xfb   : > { %385 = vst [vmem:[#allocation2 + $0x30] sm:$0xff] %v371_v37 }
 0x102   : > { %v395_v38 = vld [vmem:[%s394_s24] sm:$0xff]  ;;  %s1911_s24 = scalar_select %p391_p4, 5, 2 }
 0x103   : > { %v470_v39 = vadd.f32 %v466_v25, %v395_v38  ;;  %v504_v54 = vld [vmem:[%s503_s7] sm:$0xff] }
 0x104   : > { %v611_v12 = vld [vmem:[%s610_s11] sm:$0xff]  ;;  %s1392_s27 = sshll.u32 %s1911_s24, 3 }
 0x105   : > { %1625 = vtanh.f32 %v470_v39  ;;  %v1379_v41 = vmul.f32 -1.442695, %v470_v39  ;;  %v718_v30 = vld [vmem:[%s717_s17] sm:$0xff]  ;;  %s931_s28 = scalar_lea.vmem [#allocation2], %s1392_s27  ;;  %s1034_s29 = scalar_lea.vmem %s1826_s30, %s1392_s27 }
 0x107   : > { %1627 = vpow2.f32 %v1379_v41 }
 0x10f   : > { %v1626_v40 = vpop.eup %1625 }
 0x110   : > { %480 = vrot.lane.b32.xlu0 %v1626_v40, %s1700_s25 }
 0x111   : > { %v1628_v42 = vpop.eup %1627 }
 0x112   : > { %v474_v43 = vadd.f32 1.0, %v1628_v42 }
 0x114   : > { %1629 = vrcp.f32 %v474_v43 }
 0x11e   : > { %v1630_v44 = vpop.eup %1629 }
 0x11f   : > { %v478_v47 = vmul.f32 0.0, %v1630_v44 }
 0x182   : > { %v481_v45 = vpop.permute.xlu0 %480 }
 0x183   : > { %v483_v46 = vmul.f32 %v1630_v44, %v481_v45 }
 0x185   : > { %485 = vrot.lane.b32.xlu0 %v483_v46, %s1701_s26 }
 0x1f7   : > { %v486_v48 = vpop.permute.xlu0 %485 }
 0x1f8   : > { %v488_v49 = vadd.f32 %v486_v48, %v478_v47  ;;  %v825_v48 = vld [vmem:[%s824_s22] sm:$0xff] }
 0x1fa   : > { %1631 = vtanh.f32 %v488_v49 }
 0x204   : > { %v1632_v50 = vpop.eup %1631 }
 0x205   : > { %491 = vrot.lane.b32.xlu1 %v1632_v50, %s1700_s25 }
 0x277   : > { %v492_v51 = vpop.permute.xlu1 %491 }
 0x278   : > { %v494_v52 = vmul.f32 %v1630_v44, %v492_v51 }
 0x27a   : > { %496 = vrot.lane.b32.xlu1 %v494_v52, %s1701_s26 }
 0x2ec   : > { %v497_v53 = vpop.permute.xlu1 %496 }
 0x2ed   : > { %500 = vst.msk [vmem:[%s499_s5] sm:$0xff] %vm396_vm2, %v497_v53  ;;  %1492 = vmatmul.mubr.msk.f32.vlgmr.msra.gmra.mrb[2].mxu1 %vm396_vm2, %v497_v53  ;;  %s1923_s5 = scalar_select %p391_p4, 6, 1 }
 0x2ee   : > { %1584 = vmatpush3.bf16.msra.mxu1 %v1756_v10  ;;  %1513 = vmatprep.mubr.msk.f32.mxu1 %vm1698_vm1, %v1699_v2 }
 0x2ef   : > { %1585 = vmatprep.subr.bf16.mxu1 %v1697_v1  ;;  %s1395_s19 = sshll.u32 %s1923_s5, 3 }
 0x2f0   : > { %s1038_s6 = scalar_lea.vmem [#allocation2], %s1395_s19  ;;  %s1141_s7 = scalar_lea.vmem %s1826_s30, %s1395_s19 }
 0x2f2   : > { %1587 = vmatpush3.bf16.msra.mxu1 %v1758_v11 }
 0x2f3   : > { %1594 = vmatprep.subr.bf16.mxu1 %v1697_v1 }
 0x3c0   : > { %v573_v55 = vpop.f32.mrb[2].mxu1 }
 0x3c1   : > { %v577_v56 = vadd.f32 %v573_v55, %v504_v54  ;;  %v1493_v57 = vpop.f32.mrb[3].mxu1 }
 0x3c3   : > { %1633 = vtanh.f32 %v577_v56  ;;  %v1382_v59 = vmul.f32 -1.442695, %v577_v56 }
 0x3c5   : > { %1635 = vpow2.f32 %v1382_v59 }
 0x3cd   : > { %v1634_v58 = vpop.eup %1633 }
 0x3ce   : > { %587 = vrot.lane.b32.xlu0 %v1634_v58, %s1700_s25 }
 0x3cf   : > { %v1636_v60 = vpop.eup %1635 }
 0x3d0   : > { %v581_v61 = vadd.f32 1.0, %v1636_v60 }
 0x3d2   : > { %1637 = vrcp.f32 %v581_v61 }
 0x3dc   : > { %v1638_v62 = vpop.eup %1637 }
 0x3dd   : > { %v585_v3 = vmul.f32 %v1638_v62, %v488_v49 }
 0x440   : > { %v588_v63 = vpop.permute.xlu0 %587 }
 0x441   : > { %v590_v0 = vmul.f32 %v1638_v62, %v588_v63 }
 0x443   : > { %592 = vrot.lane.b32.xlu1 %v590_v0, %s1701_s26 }
 0x4b5   : > { %v593_v4 = vpop.permute.xlu1 %592 }
 0x4b6   : > { %v595_v5 = vadd.f32 %v593_v4, %v585_v3  ;;  %v932_v4 = vld [vmem:[%s931_s28] sm:$0xff] }
 0x4b8   : > { %1639 = vtanh.f32 %v595_v5 }
 0x4c2   : > { %v1640_v6 = vpop.eup %1639 }
 0x4c3   : > { %598 = vrot.lane.b32.xlu0 %v1640_v6, %s1700_s25 }
 0x535   : > { %v599_v7 = vpop.permute.xlu0 %598 }
 0x536   : > { %v601_v8 = vmul.f32 %v1638_v62, %v599_v7 }
 0x538   : > { %603 = vrot.lane.b32.xlu1 %v601_v8, %s1701_s26 }
 0x5aa   : > { %v604_v9 = vpop.permute.xlu1 %603 }
 0x5ab   : > { %607 = vst.msk [vmem:[%s606_s8] sm:$0xff] %vm396_vm2, %v604_v9  ;;  %1503 = vmatmul.mubr.msk.f32.vlgmr.msra.gmra.mrb[8].mxu0 %vm396_vm2, %v604_v9  ;;  %s1935_s8 = scalar_select %p391_p4, 7, 0 }
 0x5ac   : > { %1590 = vmatpush3.bf16.msra.mxu0 %v1756_v10  ;;  %1524 = vmatprep.mubr.msk.f32.mxu0 %vm1698_vm1, %v1699_v2 }
 0x5ad   : > { %1591 = vmatprep.subr.bf16.mxu0 %v1697_v1  ;;  %s1398_s9 = sshll.u32 %s1935_s8, 3 }
 0x5ae   : > { %s1145_s10 = scalar_lea.vmem [#allocation2], %s1398_s9  ;;  %s1248_s16 = scalar_lea.vmem %s1826_s30, %s1398_s9 }
 0x5b0   : > { %1593 = vmatpush3.bf16.msra.mxu0 %v1758_v11 }
 0x5b1   : > { %1600 = vmatprep.subr.bf16.mxu0 %v1697_v1 }
 0x67e   : > { %v680_v13 = vpop.f32.mrb[8].mxu0 }
 0x67f   : > { %v684_v14 = vadd.f32 %v680_v13, %v611_v12  ;;  %v1504_v15 = vpop.f32.mrb[9].mxu0 }
 0x681   : > { %1641 = vtanh.f32 %v684_v14  ;;  %v1385_v17 = vmul.f32 -1.442695, %v684_v14 }
 0x683   : > { %1643 = vpow2.f32 %v1385_v17 }
 0x68b   : > { %v1642_v16 = vpop.eup %1641 }
 0x68c   : > { %694 = vrot.lane.b32.xlu0 %v1642_v16, %s1700_s25 }
 0x68d   : > { %v1644_v18 = vpop.eup %1643 }
 0x68e   : > { %v688_v19 = vadd.f32 1.0, %v1644_v18 }
 0x690   : > { %1645 = vrcp.f32 %v688_v19 }
 0x69a   : > { %v1646_v20 = vpop.eup %1645 }
 0x69b   : > { %v692_v23 = vmul.f32 %v1646_v20, %v595_v5 }
 0x6fe   : > { %v695_v21 = vpop.permute.xlu0 %694 }
 0x6ff   : > { %v697_v22 = vmul.f32 %v1646_v20, %v695_v21 }
 0x701   : > { %699 = vrot.lane.b32.xlu1 %v697_v22, %s1701_s26 }
 0x773   : > { %v700_v24 = vpop.permute.xlu1 %699 }
 0x774   : > { %v702_v25 = vadd.f32 %v700_v24, %v692_v23 }
 0x776   : > { %1647 = vtanh.f32 %v702_v25 }
 0x780   : > { %v1648_v26 = vpop.eup %1647 }
 0x781   : > { %705 = vrot.lane.b32.xlu0 %v1648_v26, %s1700_s25 }
 0x7f3   : > { %v706_v27 = vpop.permute.xlu0 %705 }
 0x7f4   : > { %v708_v28 = vmul.f32 %v1646_v20, %v706_v27  ;;  %v1039_v20 = vld [vmem:[%s1038_s6] sm:$0xff] }
 0x7f6   : > { %710 = vrot.lane.b32.xlu1 %v708_v28, %s1701_s26 }
 0x868   : > { %v711_v29 = vpop.permute.xlu1 %710 }
 0x869   : > { %714 = vst.msk [vmem:[%s713_s12] sm:$0xff] %vm396_vm2, %v711_v29  ;;  %1514 = vmatmul.mubr.msk.f32.vlgmr.msra.gmra.mrb[4].mxu1 %vm396_vm2, %v711_v29 }
 0x86a   : > { %1596 = vmatpush3.bf16.msra.mxu1 %v1756_v10  ;;  %1535 = vmatprep.mubr.msk.f32.mxu1 %vm1698_vm1, %v1699_v2 }
 0x86b   : > { %1597 = vmatprep.subr.bf16.mxu1 %v1697_v1 }
 0x86e   : > { %1599 = vmatpush3.bf16.msra.mxu1 %v1758_v11 }
 0x86f   : > { %1606 = vmatprep.subr.bf16.mxu1 %v1697_v1 }
 0x93c   : > { %v787_v31 = vpop.f32.mrb[4].mxu1 }
 0x93d   : > { %v791_v32 = vadd.f32 %v787_v31, %v718_v30  ;;  %v1515_v33 = vpop.f32.mrb[5].mxu1 }
 0x93f   : > { %1649 = vtanh.f32 %v791_v32  ;;  %v1388_v35 = vmul.f32 -1.442695, %v791_v32 }
 0x941   : > { %1651 = vpow2.f32 %v1388_v35 }
 0x949   : > { %v1650_v34 = vpop.eup %1649 }
 0x94a   : > { %801 = vrot.lane.b32.xlu0 %v1650_v34, %s1700_s25 }
 0x94b   : > { %v1652_v36 = vpop.eup %1651 }
 0x94c   : > { %v795_v37 = vadd.f32 1.0, %v1652_v36 }
 0x94e   : > { %1653 = vrcp.f32 %v795_v37 }
 0x958   : > { %v1654_v38 = vpop.eup %1653 }
 0x959   : > { %v799_v41 = vmul.f32 %v1654_v38, %v702_v25 }
 0x9bc   : > { %v802_v39 = vpop.permute.xlu0 %801 }
 0x9bd   : > { %v804_v40 = vmul.f32 %v1654_v38, %v802_v39 }
 0x9bf   : > { %806 = vrot.lane.b32.xlu1 %v804_v40, %s1701_s26 }
 0xa31   : > { %v807_v42 = vpop.permute.xlu1 %806 }
 0xa32   : > { %v809_v43 = vadd.f32 %v807_v42, %v799_v41 }
 0xa34   : > { %1655 = vtanh.f32 %v809_v43 }
 0xa3e   : > { %v1656_v44 = vpop.eup %1655 }
 0xa3f   : > { %812 = vrot.lane.b32.xlu0 %v1656_v44, %s1700_s25 }
 0xab1   : > { %v813_v45 = vpop.permute.xlu0 %812 }
 0xab2   : > { %v815_v46 = vmul.f32 %v1654_v38, %v813_v45  ;;  %v1146_v38 = vld [vmem:[%s1145_s10] sm:$0xff] }
 0xab4   : > { %817 = vrot.lane.b32.xlu1 %v815_v46, %s1701_s26 }
 0xb26   : > { %v818_v47 = vpop.permute.xlu1 %817 }
 0xb27   : > { %821 = vst.msk [vmem:[%s820_s18] sm:$0xff] %vm396_vm2, %v818_v47  ;;  %1525 = vmatmul.mubr.msk.f32.vlgmr.msra.gmra.mrb[10].mxu0 %vm396_vm2, %v818_v47 }
 0xb28   : > { %1602 = vmatpush3.bf16.msra.mxu0 %v1756_v10  ;;  %1546 = vmatprep.mubr.msk.f32.mxu0 %vm1698_vm1, %v1699_v2 }
 0xb29   : > { %1603 = vmatprep.subr.bf16.mxu0 %v1697_v1 }
 0xb2c   : > { %1605 = vmatpush3.bf16.msra.mxu0 %v1758_v11 }
 0xbfa   : > { %v894_v49 = vpop.f32.mrb[10].mxu0 }
 0xbfb   : > { %v898_v50 = vadd.f32 %v894_v49, %v825_v48  ;;  %v1526_v51 = vpop.f32.mrb[11].mxu0 }
 0xbfd   : > { %1657 = vtanh.f32 %v898_v50  ;;  %v1391_v53 = vmul.f32 -1.442695, %v898_v50 }
 0xbff   : > { %1659 = vpow2.f32 %v1391_v53 }
 0xc07   : > { %v1658_v52 = vpop.eup %1657 }
 0xc08   : > { %908 = vrot.lane.b32.xlu0 %v1658_v52, %s1700_s25 }
 0xc09   : > { %v1660_v54 = vpop.eup %1659 }
 0xc0a   : > { %v902_v55 = vadd.f32 1.0, %v1660_v54 }
 0xc0c   : > { %1661 = vrcp.f32 %v902_v55 }
 0xc16   : > { %v1662_v56 = vpop.eup %1661 }
 0xc17   : > { %v906_v59 = vmul.f32 %v1662_v56, %v809_v43 }
 0xc7a   : > { %v909_v57 = vpop.permute.xlu0 %908 }
 0xc7b   : > { %v911_v58 = vmul.f32 %v1662_v56, %v909_v57 }
 0xc7d   : > { %913 = vrot.lane.b32.xlu1 %v911_v58, %s1701_s26 }
 0xcef   : > { %v914_v60 = vpop.permute.xlu1 %913 }
 0xcf0   : > { %v916_v61 = vadd.f32 %v914_v60, %v906_v59 }
 0xcf2   : > { %1663 = vtanh.f32 %v916_v61 }
 0xcfc   : > { %v1664_v62 = vpop.eup %1663 }
 0xcfd   : > { %919 = vrot.lane.b32.xlu0 %v1664_v62, %s1700_s25 }
 0xd6f   : > { %v920_v63 = vpop.permute.xlu0 %919 }
 0xd70   : > { %v922_v0 = vmul.f32 %v1662_v56, %v920_v63 }
 0xd72   : > { %924 = vrot.lane.b32.xlu1 %v922_v0, %s1701_s26 }
 0xde4   : > { %v925_v3 = vpop.permute.xlu1 %924 }
 0xde5   : > { %928 = vst.msk [vmem:[%s927_s23] sm:$0xff] %vm396_vm2, %v925_v3  ;;  %1536 = vmatmul.mubr.msk.f32.vlgmr.msra.gmra.mrb[6].mxu1 %vm396_vm2, %v925_v3 }
 0xde6   : > { %1608 = vmatpush3.bf16.msra.mxu1 %v1756_v10  ;;  %1557 = vmatprep.mubr.msk.f32.mxu1 %vm1698_vm1, %v1699_v2 }
 0xde7   : > { %1609 = vmatprep.subr.bf16.mxu1 %v1697_v1 }
 0xdea   : > { %1611 = vmatpush3.bf16.msra.mxu1 %v1758_v11 }
 0xeb8   : > { %v1001_v5 = vpop.f32.mrb[6].mxu1 }
 0xeb9   : > { %v1005_v6 = vadd.f32 %v1001_v5, %v932_v4  ;;  %v1537_v7 = vpop.f32.mrb[7].mxu1 }
 0xebb   : > { %1665 = vtanh.f32 %v1005_v6  ;;  %v1394_v10 = vmul.f32 -1.442695, %v1005_v6 }
 0xebd   : > { %1667 = vpow2.f32 %v1394_v10 }
 0xec5   : > { %v1666_v8 = vpop.eup %1665 }
 0xec6   : > { %1015 = vrot.lane.b32.xlu0 %v1666_v8, %s1700_s25 }
 0xec7   : > { %v1668_v2 = vpop.eup %1667 }
 0xec8   : > { %v1009_v1 = vadd.f32 1.0, %v1668_v2 }
 0xeca   : > { %1669 = vrcp.f32 %v1009_v1 }
 0xed4   : > { %v1670_v11 = vpop.eup %1669 }
 0xed5   : > { %v1013_v13 = vmul.f32 %v1670_v11, %v916_v61 }
 0xf38   : > { %v1016_v9 = vpop.permute.xlu0 %1015 }
 0xf39   : > { %v1018_v12 = vmul.f32 %v1670_v11, %v1016_v9 }
 0xf3b   : > { %1020 = vrot.lane.b32.xlu1 %v1018_v12, %s1701_s26 }
 0xfad   : > { %v1021_v14 = vpop.permute.xlu1 %1020 }
 0xfae   : > { %v1023_v15 = vadd.f32 %v1021_v14, %v1013_v13 }
 0xfb0   : > { %1671 = vtanh.f32 %v1023_v15 }
 0xfba   : > { %v1672_v16 = vpop.eup %1671 }
 0xfbb   : > { %1026 = vrot.lane.b32.xlu0 %v1672_v16, %s1700_s25 }
0x102d   : > { %v1027_v17 = vpop.permute.xlu0 %1026 }
0x102e   : > { %v1029_v18 = vmul.f32 %v1670_v11, %v1027_v17 }
0x1030   : > { %1031 = vrot.lane.b32.xlu1 %v1029_v18, %s1701_s26 }
0x10a2   : > { %v1032_v19 = vpop.permute.xlu1 %1031 }
0x10a3   : > { %1035 = vst.msk [vmem:[%s1034_s29] sm:$0xff] %vm396_vm2, %v1032_v19  ;;  %1547 = vmatmul.mubr.msk.f32.vlgmr.msra.gmra.mrb[12].mxu0 %vm396_vm2, %v1032_v19 }
0x1176   : > { %v1108_v21 = vpop.f32.mrb[12].mxu0 }
0x1177   : > { %v1112_v22 = vadd.f32 %v1108_v21, %v1039_v20  ;;  %v1548_v23 = vpop.f32.mrb[13].mxu0 }
0x1179   : > { %1673 = vtanh.f32 %v1112_v22  ;;  %v1397_v25 = vmul.f32 -1.442695, %v1112_v22 }
0x117b   : > { %1675 = vpow2.f32 %v1397_v25 }
0x1183   : > { %v1674_v24 = vpop.eup %1673 }
0x1184   : > { %1122 = vrot.lane.b32.xlu0 %v1674_v24, %s1700_s25 }
0x1185   : > { %v1676_v26 = vpop.eup %1675 }
0x1186   : > { %v1116_v27 = vadd.f32 1.0, %v1676_v26 }
0x1188   : > { %1677 = vrcp.f32 %v1116_v27 }
0x1192   : > { %v1678_v28 = vpop.eup %1677 }
0x1193   : > { %v1120_v31 = vmul.f32 %v1678_v28, %v1023_v15 }
0x11f6   : > { %v1123_v29 = vpop.permute.xlu0 %1122 }
0x11f7   : > { %v1125_v30 = vmul.f32 %v1678_v28, %v1123_v29 }
0x11f9   : > { %1127 = vrot.lane.b32.xlu1 %v1125_v30, %s1701_s26 }
0x126b   : > { %v1128_v32 = vpop.permute.xlu1 %1127 }
0x126c   : > { %v1130_v33 = vadd.f32 %v1128_v32, %v1120_v31 }
0x126e   : > { %1679 = vtanh.f32 %v1130_v33 }
0x1278   : > { %v1680_v34 = vpop.eup %1679 }
0x1279   : > { %1133 = vrot.lane.b32.xlu0 %v1680_v34, %s1700_s25 }
0x12eb   : > { %v1134_v35 = vpop.permute.xlu0 %1133 }
0x12ec   : > { %v1136_v36 = vmul.f32 %v1678_v28, %v1134_v35 }
0x12ee   : > { %1138 = vrot.lane.b32.xlu1 %v1136_v36, %s1701_s26 }
0x1360   : > { %v1139_v37 = vpop.permute.xlu1 %1138 }
0x1361   : > { %1142 = vst.msk [vmem:[%s1141_s7] sm:$0xff] %vm396_vm2, %v1139_v37  ;;  %1558 = vmatmul.mubr.msk.f32.vlgmr.msra.gmra.mrb[8].mxu1 %vm396_vm2, %v1139_v37 }
0x1434   : > { %v1215_v39 = vpop.f32.mrb[8].mxu1 }
0x1435   : > { %v1219_v40 = vadd.f32 %v1215_v39, %v1146_v38  ;;  %v1559_v41 = vpop.f32.mrb[9].mxu1 }
0x1437   : > { %1681 = vtanh.f32 %v1219_v40  ;;  %v1400_v43 = vmul.f32 -1.442695, %v1219_v40 }
0x1439   : > { %1683 = vpow2.f32 %v1400_v43 }
0x1441   : > { %v1682_v42 = vpop.eup %1681 }
0x1442   : > { %1229 = vrot.lane.b32.xlu0 %v1682_v42, %s1700_s25 }
0x1443   : > { %v1684_v44 = vpop.eup %1683 }
0x1444   : > { %v1223_v45 = vadd.f32 1.0, %v1684_v44 }
0x1446   : > { %1685 = vrcp.f32 %v1223_v45 }
0x1450   : > { %v1686_v46 = vpop.eup %1685 }
0x1451   : > { %v1227_v49 = vmul.f32 %v1686_v46, %v1130_v33 }
0x14b4   : > { %v1230_v47 = vpop.permute.xlu0 %1229 }
0x14b5   : > { %v1232_v48 = vmul.f32 %v1686_v46, %v1230_v47 }
0x14b7   : > { %1234 = vrot.lane.b32.xlu1 %v1232_v48, %s1701_s26 }
0x1529   : > { %v1235_v50 = vpop.permute.xlu1 %1234 }
0x152a   : > { %v1237_v51 = vadd.f32 %v1235_v50, %v1227_v49 }
0x152c   : > { %1687 = vtanh.f32 %v1237_v51 }
0x1536   : > { %v1688_v52 = vpop.eup %1687 }
0x1537   : > { %1240 = vrot.lane.b32.xlu0 %v1688_v52, %s1700_s25 }
0x15a9   : > { %v1241_v53 = vpop.permute.xlu0 %1240 }
0x15aa   : > { %v1243_v54 = vmul.f32 %v1686_v46, %v1241_v53 }
0x15ac   : > { %1245 = vrot.lane.b32.xlu1 %v1243_v54, %s1701_s26 }
0x161e   : > { %v1246_v55 = vpop.permute.xlu1 %1245 }
0x161f   : > { %1249 = vst.msk [vmem:[%s1248_s16] sm:$0xff] %vm396_vm2, %v1246_v55 }
0x1620 PF: > { %s14_s15 = sadd.s32 1, %s1695_s15  }
0x1621   : > { %p11_p5 = scmp.ge.s32.totalorder %s14_s15, 4  }
0x1623   :  { %13 = sbr.rel (!%p11_p5) target bundleno = 1 (0x1), region = 88 }

// kernel: my_lstm_forward.4
= control target key start
LH: loop header
LB: loop body
LE: loop exit
PB: predicated region body
PF: predicated region fallthrough
CT: control target
= control target key end

     0   :  { %s1763_s15 = smov 0   ;;  %s1986_s0 = inlined_call_operand.vmem [shape: f32[8,8,64], index: 0, kind: input, shape index: {}]   ;;  %s1987_s1 = inlined_call_operand.vmem [shape: f32[2,64,128], index: 1, kind: input, shape index: {}]   ;;  %s1988_s2 = inlined_call_operand.vmem [shape: f32[2,32,128], index: 2, kind: input, shape index: {}]   ;;  %s1989_s3 = inlined_call_operand.vmem [shape: f32[2,1,128], index: 3, kind: input, shape index: {}]   ;;  %s1990_s4 = inlined_call_operand.vmem [shape: f32[2,8,8,32], index: 4, kind: output, shape index: {}]  }
   0x1 LB: > { %s1769_s16 = sadd.s32 4294967295, %s1731_s15   ;;  %p1368_p0 = scmp.ge.s32.totalorder %s1731_s15, 1  ;;  %s1731_s15 = sphi %s1763_s15, %s14_s15  }
   0x2   : > { %p180_p1 = scmp.lt.s32.totalorder %s1731_s15, 3 }
   0x4   : > { %p181_p2 = pnand %p1368_p0, %p180_p1 }
   0x5   : > { %p214_p3 = scmp.lt.s32.totalorder (!%p181_p2), %s1769_s16, 1  ;;  %v232_v0 = vld [vmem:[%s1986_s0] sm:$0xff] (!%p181_p2)  ;;  %vm255_vm0 = vcmask (!%p181_p2), 523264   ;;  %v1733_v1 = vmov (!%p181_p2), 0.0|0.0   ;;  %vm1734_vm1 = vmmov (!%p181_p2), 0   ;;  %v1735_v2 = vmov (!%p181_p2), 0.0  }
   0x6   : > { %184 = sbr.rel (%p181_p2) target bundleno = 5676 (0x162c), region = 36  ;;  %1484 = vmatprep.mubr.msk.f32.mxu0 (!%p181_p2), %vm255_vm0, %v232_v0  ;;  %1600 = vmatprep.subr.bf16.mxu1 (!%p181_p2), %v1733_v1  ;;  %v233_v21 = vld [vmem:[%s1986_s0 + $0x8] sm:$0xff] (!%p181_p2)  ;;  %v234_v22 = vld [vmem:[%s1986_s0 + $0x10] sm:$0xff] (!%p181_p2)  ;;  %v235_v23 = vld [vmem:[%s1986_s0 + $0x18] sm:$0xff] (!%p181_p2)  ;;  %p397_p4 = scmp.eq.s32.totalorder (!%p181_p2), %s1769_s16, 0  ;;  %vm402_vm2 = vcmask (!%p181_p2), 261120  }
   0x7   : > { %1504 = vmatprep.mubr.msk.f32.mxu1 (!%p181_p2), %vm1734_vm1, %v1735_v2  ;;  %v236_v24 = vld [vmem:[%s1986_s0 + $0x20] sm:$0xff] (!%p181_p2)  ;;  %v237_v25 = vld [vmem:[%s1986_s0 + $0x28] sm:$0xff] (!%p181_p2)  ;;  %v238_v26 = vld [vmem:[%s1986_s0 + $0x30] sm:$0xff] (!%p181_p2)  ;;  %s1736_s26 = smov (!%p181_p2), 64  }
   0x8   : > { %v239_v27 = vld [vmem:[%s1986_s0 + $0x38] sm:$0xff] (!%p181_p2) }
   0xd   : > { %s1780_s19 = scalar_select %p214_p3, %s1769_s16, 1 }
   0xe   : > { %s1851_s23 = scalar_select %p397_p4, 0, 7 }
   0xf   : > { %s1409_s20 = sshll.u32 %s1780_s19, 6  ;;  %s1410_s21 = sshll.u32 %s1780_s19, 5 }
  0x10   : > { %s218_s24 = scalar_lea.vmem %s1987_s1, %s1409_s20  ;;  %s223_s27 = scalar_lea.vmem %s1988_s2, %s1410_s21 }
  0x11   : > { %v240_v3 = vld [vmem:[%s218_s24] sm:$0xff]  ;;  %v241_v4 = vld [vmem:[%s218_s24 + $0x8] sm:$0xff]  ;;  %v242_v5 = vld [vmem:[%s218_s24 + $0x10] sm:$0xff]  ;;  %s226_s22 = scalar_lea.vmem %s1989_s3, %s1780_s19  ;;  %s1865_s30 = scalar_lea.vmem %s1990_s4, %s1409_s20 }
  0x12   : > { %v1584_v6 = vpack.c.bf16 %v241_v4, %v240_v3  ;;  %v243_v7 = vld [vmem:[%s218_s24 + $0x18] sm:$0xff]  ;;  %v244_v9 = vld [vmem:[%s218_s24 + $0x20] sm:$0xff]  ;;  %v245_v10 = vld [vmem:[%s218_s24 + $0x28] sm:$0xff]  ;;  %s1880_s19 = scalar_select %p397_p4, 1, 6 }
  0x13   : > { %v1588_v8 = vpack.c.bf16 %v243_v7, %v242_v5  ;;  %v393_v11 = vld [vmem:[%s223_s27] sm:$0xff]  ;;  %v394_v12 = vld [vmem:[%s223_s27 + $0x8] sm:$0xff]  ;;  %v395_v13 = vld [vmem:[%s223_s27 + $0x10] sm:$0xff]  ;;  %v1592_v16 = vpack.c.bf16 %v245_v10, %v244_v9  ;;  %s1898_s8 = scalar_select %p397_p4, 2, 5 }
  0x14   : > { %1585 = vmatprep.subr.bf16.mxu0 %v1584_v6  ;;  %v396_v14 = vld [vmem:[%s223_s27 + $0x18] sm:$0xff]  ;;  %v1794_v15 = vpack.c.bf16 %v394_v12, %v393_v11  ;;  %v246_v17 = vld [vmem:[%s218_s24 + $0x30] sm:$0xff]  ;;  %v1375_v30 = vld [vmem:[%s226_s22] ss:$0 sm:$0xff]  ;;  %s1737_s27 = smov 32   ;;  %s1386_s20 = sshll.u32 %s1880_s19, 3 }
  0x15   : > { %1587 = vmatpush3.bf16.msra.mxu0 %v1584_v6  ;;  %v247_v18 = vld [vmem:[%s218_s24 + $0x38] sm:$0xff]  ;;  %v1797_v19 = vpack.c.bf16 %v396_v14, %v395_v13  ;;  %s1384_s24 = sshll.u32 %s1851_s23, 3  ;;  %s509_s6 = scalar_lea.vmem [#allocation2], %s1386_s20 }
  0x16   : > { %1589 = vmatprep.subr.bf16.mxu0 %v1588_v8  ;;  %1602 = vmatpush3.bf16.msra.mxu1 %v1794_v15  ;;  %v1596_v20 = vpack.c.bf16 %v247_v18, %v246_v17  ;;  %s400_s25 = scalar_lea.vmem [#allocation2], %s1384_s24  ;;  %s505_s5 = scalar_lea.vmem %s1865_s30, %s1384_s24 }
  0x17   : > { %1603 = vmatprep.subr.bf16.mxu1 %v1733_v1  ;;  %s612_s7 = scalar_lea.vmem %s1865_s30, %s1386_s20  ;;  %s1389_s9 = sshll.u32 %s1898_s8, 3 }
  0x18   : > { %s616_s10 = scalar_lea.vmem [#allocation2], %s1389_s9  ;;  %s719_s11 = scalar_lea.vmem %s1865_s30, %s1389_s9 }
  0x19   : > { %1591 = vmatpush3.bf16.msra.mxu0 %v1588_v8  ;;  %s1916_s12 = scalar_select %p397_p4, 3, 4 }
  0x1a   : > { %1593 = vmatprep.subr.bf16.mxu0 %v1592_v16  ;;  %1605 = vmatpush3.bf16.msra.mxu1 %v1797_v19  ;;  %s1933_s18 = scalar_select %p397_p4, 4, 3 }
  0x1b   : > { %1606 = vmatprep.subr.bf16.mxu1 %v1733_v1  ;;  %s1392_s13 = sshll.u32 %s1916_s12, 3 }
  0x1c   : > { %s723_s14 = scalar_lea.vmem [#allocation2], %s1392_s13  ;;  %s826_s17 = scalar_lea.vmem %s1865_s30, %s1392_s13 }
  0x1d   : > { %1595 = vmatpush3.bf16.msra.mxu0 %v1592_v16  ;;  %1505 = vmatmul.mubr.f32.vlgmr.msra.gmra.mrb[0].mxu1 %v1735_v2  ;;  %s1395_s21 = sshll.u32 %s1933_s18, 3 }
  0x1e   : > { %1597 = vmatprep.subr.bf16.mxu0 %v1596_v20  ;;  %1608 = vmatpush3.bf16.msra.mxu1 %v1794_v15  ;;  %s830_s22 = scalar_lea.vmem [#allocation2], %s1395_s21  ;;  %s933_s23 = scalar_lea.vmem %s1865_s30, %s1395_s21 }
  0x1f   : > { %1515 = vmatprep.mubr.msk.f32.mxu1 %vm1734_vm1, %v1735_v2  ;;  %1609 = vmatprep.subr.bf16.mxu1 %v1733_v1  ;;  %s1950_s24 = scalar_select %p397_p4, 5, 2 }
  0x21   : > { %1599 = vmatpush3.bf16.msra.mxu0 %v1596_v20 }
  0x22   : > { %1618 = vmatprep.subr.bf16.mxu0 %v1733_v1  ;;  %1611 = vmatpush3.bf16.msra.mxu1 %v1797_v19 }
  0x23   : > { %1612 = vmatprep.subr.bf16.mxu1 %v1733_v1 }
  0x24   : > { %1485 = vmatmul.mubr.msk.f32.vlgmr.msra.gmra.mrb[0].mxu0 %vm255_vm0, %v233_v21 }
  0x25   : > { %1487 = vmatprep.mubr.msk.f32.mxu0 %vm255_vm0, %v234_v22  ;;  %1620 = vmatpush3.bf16.msra.mxu0 %v1794_v15 }
  0x26   : > { %1621 = vmatprep.subr.bf16.mxu0 %v1733_v1 }
  0x28   : > { %1488 = vmatmul.mubr.msk.f32.gmra.mrb[2].mxu0 %vm255_vm0, %v235_v23 }
  0x29   : > { %1490 = vmatprep.mubr.msk.f32.mxu0 %vm255_vm0, %v236_v24  ;;  %1623 = vmatpush3.bf16.msra.mxu0 %v1797_v19 }
  0x2a   : > { %1630 = vmatprep.subr.bf16.mxu0 %v1733_v1 }
  0x2c   : > { %1491 = vmatmul.mubr.msk.f32.gmra.mrb[4].mxu0 %vm255_vm0, %v237_v25 }
  0x2d   : > { %1493 = vmatprep.mubr.msk.f32.mxu0 %vm255_vm0, %v238_v26 }
  0x30   : > { %1494 = vmatmul.mubr.msk.f32.gmra.mrb[6].mxu0 %vm255_vm0, %v239_v27 }
  0x31   : > { %1537 = vmatprep.mubr.msk.f32.mxu0 %vm1734_vm1, %v1735_v2 }
  0xf0   : > { %v472_v28 = vpop.f32.mrb[0].mxu1 }
  0xf1   : > { %v1506_v29 = vpop.f32.mrb[1].mxu1 }
  0xf7   : > { %v1486_v31 = vpop.f32.mrb[0].mxu0 }
  0xf8   : > { %v352_v32 = vadd.f32 %v1486_v31, %v1375_v30  ;;  %v346_v33 = vpop.f32.mrb[1].mxu0 }
  0xf9   : > { %v347_v34 = vadd.f32 %v1375_v30, %v346_v33 }
  0xfa   : > { %386 = vst [vmem:[#allocation2 + $0x8] sm:$0xff] %v352_v32 }
  0xfb   : > { %385 = vst [vmem:[#allocation2] sm:$0xff] %v347_v34  ;;  %v1489_v35 = vpop.f32.mrb[2].mxu0 }
  0xfc   : > { %v362_v36 = vadd.f32 %v1489_v35, %v1375_v30  ;;  %v356_v37 = vpop.f32.mrb[3].mxu0 }
  0xfd   : > { %v357_v38 = vadd.f32 %v1375_v30, %v356_v37 }
  0xfe   : > { %388 = vst [vmem:[#allocation2 + $0x18] sm:$0xff] %v362_v36 }
  0xff   : > { %387 = vst [vmem:[#allocation2 + $0x10] sm:$0xff] %v357_v38  ;;  %v1492_v39 = vpop.f32.mrb[4].mxu0 }
 0x100   : > { %v372_v40 = vadd.f32 %v1492_v39, %v1375_v30  ;;  %v366_v41 = vpop.f32.mrb[5].mxu0 }
 0x101   : > { %v367_v42 = vadd.f32 %v1375_v30, %v366_v41 }
 0x102   : > { %390 = vst [vmem:[#allocation2 + $0x28] sm:$0xff] %v372_v40 }
 0x103   : > { %389 = vst [vmem:[#allocation2 + $0x20] sm:$0xff] %v367_v42  ;;  %v1495_v43 = vpop.f32.mrb[6].mxu0 }
 0x104   : > { %v382_v44 = vadd.f32 %v1495_v43, %v1375_v30  ;;  %v376_v45 = vpop.f32.mrb[7].mxu0 }
 0x105   : > { %v377_v46 = vadd.f32 %v1375_v30, %v376_v45 }
 0x106   : > { %392 = vst [vmem:[#allocation2 + $0x38] sm:$0xff] %v382_v44 }
 0x107   : > { %391 = vst [vmem:[#allocation2 + $0x30] sm:$0xff] %v377_v46 }
 0x10e   : > { %v401_v47 = vld [vmem:[%s400_s25] sm:$0xff]  ;;  %s1398_s25 = sshll.u32 %s1950_s24, 3 }
 0x10f   : > { %v476_v48 = vadd.f32 %v472_v28, %v401_v47  ;;  %v510_v63 = vld [vmem:[%s509_s6] sm:$0xff]  ;;  %s937_s28 = scalar_lea.vmem [#allocation2], %s1398_s25  ;;  %s1040_s29 = scalar_lea.vmem %s1865_s30, %s1398_s25 }
 0x110   : > { %v617_v21 = vld [vmem:[%s616_s10] sm:$0xff] }
 0x111   : > { %1661 = vtanh.f32 %v476_v48  ;;  %v1385_v50 = vmul.f32 -1.442695, %v476_v48  ;;  %v724_v39 = vld [vmem:[%s723_s14] sm:$0xff] }
 0x113   : > { %1663 = vpow2.f32 %v1385_v50 }
 0x11b   : > { %v1662_v49 = vpop.eup %1661 }
 0x11c   : > { %486 = vrot.lane.b32.xlu0 %v1662_v49, %s1736_s26 }
 0x11d   : > { %v1664_v51 = vpop.eup %1663 }
 0x11e   : > { %v480_v52 = vadd.f32 1.0, %v1664_v51 }
 0x120   : > { %1665 = vrcp.f32 %v480_v52 }
 0x12a   : > { %v1666_v53 = vpop.eup %1665 }
 0x12b   : > { %v484_v56 = vmul.f32 0.0, %v1666_v53 }
 0x18e   : > { %v487_v54 = vpop.permute.xlu0 %486 }
 0x18f   : > { %v489_v55 = vmul.f32 %v1666_v53, %v487_v54 }
 0x191   : > { %491 = vrot.lane.b32.xlu0 %v489_v55, %s1737_s27 }
 0x203   : > { %v492_v57 = vpop.permute.xlu0 %491 }
 0x204   : > { %v494_v58 = vadd.f32 %v492_v57, %v484_v56  ;;  %v831_v57 = vld [vmem:[%s830_s22] sm:$0xff] }
 0x206   : > { %1667 = vtanh.f32 %v494_v58 }
 0x210   : > { %v1668_v59 = vpop.eup %1667 }
 0x211   : > { %497 = vrot.lane.b32.xlu1 %v1668_v59, %s1736_s26 }
 0x283   : > { %v498_v60 = vpop.permute.xlu1 %497 }
 0x284   : > { %v500_v61 = vmul.f32 %v1666_v53, %v498_v60 }
 0x286   : > { %502 = vrot.lane.b32.xlu1 %v500_v61, %s1737_s27 }
 0x2f8   : > { %v503_v62 = vpop.permute.xlu1 %502 }
 0x2f9   : > { %506 = vst.msk [vmem:[%s505_s5] sm:$0xff] %vm402_vm2, %v503_v62  ;;  %1516 = vmatmul.mubr.msk.f32.vlgmr.msra.gmra.mrb[2].mxu1 %vm402_vm2, %v503_v62  ;;  %s1962_s5 = scalar_select %p397_p4, 6, 1 }
 0x2fa   : > { %1614 = vmatpush3.bf16.msra.mxu1 %v1794_v15  ;;  %1526 = vmatprep.mubr.msk.f32.mxu1 %vm1734_vm1, %v1735_v2 }
 0x2fb   : > { %1615 = vmatprep.subr.bf16.mxu1 %v1733_v1  ;;  %s1401_s19 = sshll.u32 %s1962_s5, 3 }
 0x2fc   : > { %s1044_s20 = scalar_lea.vmem [#allocation2], %s1401_s19  ;;  %s1147_s6 = scalar_lea.vmem %s1865_s30, %s1401_s19 }
 0x2fe   : > { %1617 = vmatpush3.bf16.msra.mxu1 %v1797_v19 }
 0x2ff   : > { %1624 = vmatprep.subr.bf16.mxu1 %v1733_v1 }
 0x3cc   : > { %v579_v0 = vpop.f32.mrb[2].mxu1 }
 0x3cd   : > { %v583_v3 = vadd.f32 %v579_v0, %v510_v63  ;;  %v1517_v4 = vpop.f32.mrb[3].mxu1 }
 0x3cf   : > { %1669 = vtanh.f32 %v583_v3  ;;  %v1388_v6 = vmul.f32 -1.442695, %v583_v3 }
 0x3d1   : > { %1671 = vpow2.f32 %v1388_v6 }
 0x3d9   : > { %v1670_v5 = vpop.eup %1669 }
 0x3da   : > { %593 = vrot.lane.b32.xlu0 %v1670_v5, %s1736_s26 }
 0x3db   : > { %v1672_v7 = vpop.eup %1671 }
 0x3dc   : > { %v587_v8 = vadd.f32 1.0, %v1672_v7 }
 0x3de   : > { %1673 = vrcp.f32 %v587_v8 }
 0x3e8   : > { %v1674_v9 = vpop.eup %1673 }
 0x3e9   : > { %v591_v12 = vmul.f32 %v1674_v9, %v494_v58 }
 0x44c   : > { %v594_v10 = vpop.permute.xlu0 %593 }
 0x44d   : > { %v596_v11 = vmul.f32 %v1674_v9, %v594_v10 }
 0x44f   : > { %598 = vrot.lane.b32.xlu1 %v596_v11, %s1737_s27 }
 0x4c1   : > { %v599_v13 = vpop.permute.xlu1 %598 }
 0x4c2   : > { %v601_v14 = vadd.f32 %v599_v13, %v591_v12  ;;  %v938_v13 = vld [vmem:[%s937_s28] sm:$0xff] }
 0x4c4   : > { %1675 = vtanh.f32 %v601_v14 }
 0x4ce   : > { %v1676_v16 = vpop.eup %1675 }
 0x4cf   : > { %604 = vrot.lane.b32.xlu0 %v1676_v16, %s1736_s26 }
 0x541   : > { %v605_v17 = vpop.permute.xlu0 %604 }
 0x542   : > { %v607_v18 = vmul.f32 %v1674_v9, %v605_v17 }
 0x544   : > { %609 = vrot.lane.b32.xlu1 %v607_v18, %s1737_s27 }
 0x5b6   : > { %v610_v20 = vpop.permute.xlu1 %609 }
 0x5b7   : > { %613 = vst.msk [vmem:[%s612_s7] sm:$0xff] %vm402_vm2, %v610_v20  ;;  %1527 = vmatmul.mubr.msk.f32.vlgmr.msra.gmra.mrb[4].mxu1 %vm402_vm2, %v610_v20  ;;  %s1974_s7 = scalar_select %p397_p4, 7, 0 }
 0x5b8   : > { %1626 = vmatpush3.bf16.msra.mxu1 %v1794_v15  ;;  %1548 = vmatprep.mubr.msk.f32.mxu1 %vm1734_vm1, %v1735_v2 }
 0x5b9   : > { %1627 = vmatprep.subr.bf16.mxu1 %v1733_v1  ;;  %s1404_s8 = sshll.u32 %s1974_s7, 3 }
 0x5ba   : > { %s1151_s9 = scalar_lea.vmem [#allocation2], %s1404_s8  ;;  %s1254_s16 = scalar_lea.vmem %s1865_s30, %s1404_s8 }
 0x5bc   : > { %1629 = vmatpush3.bf16.msra.mxu1 %v1797_v19 }
 0x5bd   : > { %1636 = vmatprep.subr.bf16.mxu1 %v1733_v1 }
 0x68a   : > { %v686_v22 = vpop.f32.mrb[4].mxu1 }
 0x68b   : > { %v690_v23 = vadd.f32 %v686_v22, %v617_v21  ;;  %v1528_v24 = vpop.f32.mrb[5].mxu1 }
 0x68d   : > { %1677 = vtanh.f32 %v690_v23  ;;  %v1391_v26 = vmul.f32 -1.442695, %v690_v23 }
 0x68f   : > { %1679 = vpow2.f32 %v1391_v26 }
 0x697   : > { %v1678_v25 = vpop.eup %1677 }
 0x698   : > { %700 = vrot.lane.b32.xlu0 %v1678_v25, %s1736_s26 }
 0x699   : > { %v1680_v27 = vpop.eup %1679 }
 0x69a   : > { %v694_v28 = vadd.f32 1.0, %v1680_v27 }
 0x69c   : > { %1681 = vrcp.f32 %v694_v28 }
 0x6a6   : > { %v1682_v29 = vpop.eup %1681 }
 0x6a7   : > { %v698_v32 = vmul.f32 %v1682_v29, %v601_v14 }
 0x70a   : > { %v701_v30 = vpop.permute.xlu0 %700 }
 0x70b   : > { %v703_v31 = vmul.f32 %v1682_v29, %v701_v30 }
 0x70d   : > { %705 = vrot.lane.b32.xlu1 %v703_v31, %s1737_s27 }
 0x77f   : > { %v706_v33 = vpop.permute.xlu1 %705 }
 0x780   : > { %v708_v34 = vadd.f32 %v706_v33, %v698_v32 }
 0x782   : > { %1683 = vtanh.f32 %v708_v34 }
 0x78c   : > { %v1684_v35 = vpop.eup %1683 }
 0x78d   : > { %711 = vrot.lane.b32.xlu0 %v1684_v35, %s1736_s26 }
 0x7ff   : > { %v712_v36 = vpop.permute.xlu0 %711 }
 0x800   : > { %v714_v37 = vmul.f32 %v1682_v29, %v712_v36  ;;  %v1045_v29 = vld [vmem:[%s1044_s20] sm:$0xff] }
 0x802   : > { %716 = vrot.lane.b32.xlu1 %v714_v37, %s1737_s27 }
 0x874   : > { %v717_v38 = vpop.permute.xlu1 %716 }
 0x875   : > { %720 = vst.msk [vmem:[%s719_s11] sm:$0xff] %vm402_vm2, %v717_v38  ;;  %1538 = vmatmul.mubr.msk.f32.vlgmr.msra.gmra.mrb[8].mxu0 %vm402_vm2, %v717_v38 }
 0x876   : > { %1632 = vmatpush3.bf16.msra.mxu0 %v1794_v15  ;;  %1559 = vmatprep.mubr.msk.f32.mxu0 %vm1734_vm1, %v1735_v2 }
 0x877   : > { %1633 = vmatprep.subr.bf16.mxu0 %v1733_v1 }
 0x87a   : > { %1635 = vmatpush3.bf16.msra.mxu0 %v1797_v19 }
 0x87b   : > { %1642 = vmatprep.subr.bf16.mxu0 %v1733_v1 }
 0x948   : > { %v793_v40 = vpop.f32.mrb[8].mxu0 }
 0x949   : > { %v797_v41 = vadd.f32 %v793_v40, %v724_v39  ;;  %v1539_v42 = vpop.f32.mrb[9].mxu0 }
 0x94b   : > { %1685 = vtanh.f32 %v797_v41  ;;  %v1394_v44 = vmul.f32 -1.442695, %v797_v41 }
 0x94d   : > { %1687 = vpow2.f32 %v1394_v44 }
 0x955   : > { %v1686_v43 = vpop.eup %1685 }
 0x956   : > { %807 = vrot.lane.b32.xlu0 %v1686_v43, %s1736_s26 }
 0x957   : > { %v1688_v45 = vpop.eup %1687 }
 0x958   : > { %v801_v46 = vadd.f32 1.0, %v1688_v45 }
 0x95a   : > { %1689 = vrcp.f32 %v801_v46 }
 0x964   : > { %v1690_v47 = vpop.eup %1689 }
 0x965   : > { %v805_v50 = vmul.f32 %v1690_v47, %v708_v34 }
 0x9c8   : > { %v808_v48 = vpop.permute.xlu0 %807 }
 0x9c9   : > { %v810_v49 = vmul.f32 %v1690_v47, %v808_v48 }
 0x9cb   : > { %812 = vrot.lane.b32.xlu1 %v810_v49, %s1737_s27 }
 0xa3d   : > { %v813_v51 = vpop.permute.xlu1 %812 }
 0xa3e   : > { %v815_v52 = vadd.f32 %v813_v51, %v805_v50 }
 0xa40   : > { %1691 = vtanh.f32 %v815_v52 }
 0xa4a   : > { %v1692_v53 = vpop.eup %1691 }
 0xa4b   : > { %818 = vrot.lane.b32.xlu0 %v1692_v53, %s1736_s26 }
 0xabd   : > { %v819_v54 = vpop.permute.xlu0 %818 }
 0xabe   : > { %v821_v55 = vmul.f32 %v1690_v47, %v819_v54  ;;  %v1152_v47 = vld [vmem:[%s1151_s9] sm:$0xff] }
 0xac0   : > { %823 = vrot.lane.b32.xlu1 %v821_v55, %s1737_s27 }
 0xb32   : > { %v824_v56 = vpop.permute.xlu1 %823 }
 0xb33   : > { %827 = vst.msk [vmem:[%s826_s17] sm:$0xff] %vm402_vm2, %v824_v56  ;;  %1549 = vmatmul.mubr.msk.f32.vlgmr.msra.gmra.mrb[6].mxu1 %vm402_vm2, %v824_v56 }
 0xb34   : > { %1638 = vmatpush3.bf16.msra.mxu1 %v1794_v15  ;;  %1570 = vmatprep.mubr.msk.f32.mxu1 %vm1734_vm1, %v1735_v2 }
 0xb35   : > { %1639 = vmatprep.subr.bf16.mxu1 %v1733_v1 }
 0xb38   : > { %1641 = vmatpush3.bf16.msra.mxu1 %v1797_v19 }
 0xc06   : > { %v900_v58 = vpop.f32.mrb[6].mxu1 }
 0xc07   : > { %v904_v59 = vadd.f32 %v900_v58, %v831_v57  ;;  %v1550_v60 = vpop.f32.mrb[7].mxu1 }
 0xc09   : > { %1693 = vtanh.f32 %v904_v59  ;;  %v1397_v62 = vmul.f32 -1.442695, %v904_v59 }
 0xc0b   : > { %1695 = vpow2.f32 %v1397_v62 }
 0xc13   : > { %v1694_v61 = vpop.eup %1693 }
 0xc14   : > { %914 = vrot.lane.b32.xlu0 %v1694_v61, %s1736_s26 }
 0xc15   : > { %v1696_v63 = vpop.eup %1695 }
 0xc16   : > { %v908_v0 = vadd.f32 1.0, %v1696_v63 }
 0xc18   : > { %1697 = vrcp.f32 %v908_v0 }
 0xc22   : > { %v1698_v3 = vpop.eup %1697 }
 0xc23   : > { %v912_v6 = vmul.f32 %v1698_v3, %v815_v52 }
 0xc86   : > { %v915_v4 = vpop.permute.xlu0 %914 }
 0xc87   : > { %v917_v5 = vmul.f32 %v1698_v3, %v915_v4 }
 0xc89   : > { %919 = vrot.lane.b32.xlu1 %v917_v5, %s1737_s27 }
 0xcfb   : > { %v920_v7 = vpop.permute.xlu1 %919 }
 0xcfc   : > { %v922_v8 = vadd.f32 %v920_v7, %v912_v6 }
 0xcfe   : > { %1699 = vtanh.f32 %v922_v8 }
 0xd08   : > { %v1700_v9 = vpop.eup %1699 }
 0xd09   : > { %925 = vrot.lane.b32.xlu0 %v1700_v9, %s1736_s26 }
 0xd7b   : > { %v926_v10 = vpop.permute.xlu0 %925 }
 0xd7c   : > { %v928_v11 = vmul.f32 %v1698_v3, %v926_v10 }
 0xd7e   : > { %930 = vrot.lane.b32.xlu1 %v928_v11, %s1737_s27 }
 0xdf0   : > { %v931_v12 = vpop.permute.xlu1 %930 }
 0xdf1   : > { %934 = vst.msk [vmem:[%s933_s23] sm:$0xff] %vm402_vm2, %v931_v12  ;;  %1560 = vmatmul.mubr.msk.f32.vlgmr.msra.gmra.mrb[10].mxu0 %vm402_vm2, %v931_v12 }
 0xdf2   : > { %1644 = vmatpush3.bf16.msra.mxu0 %v1794_v15  ;;  %1581 = vmatprep.mubr.msk.f32.mxu0 %vm1734_vm1, %v1735_v2 }
 0xdf3   : > { %1645 = vmatprep.subr.bf16.mxu0 %v1733_v1 }
 0xdf6   : > { %1647 = vmatpush3.bf16.msra.mxu0 %v1797_v19 }
 0xec4   : > { %v1007_v14 = vpop.f32.mrb[10].mxu0 }
 0xec5   : > { %v1011_v16 = vadd.f32 %v1007_v14, %v938_v13  ;;  %v1561_v17 = vpop.f32.mrb[11].mxu0 }
 0xec7   : > { %1701 = vtanh.f32 %v1011_v16  ;;  %v1400_v15 = vmul.f32 -1.442695, %v1011_v16 }
 0xec9   : > { %1703 = vpow2.f32 %v1400_v15 }
 0xed1   : > { %v1702_v18 = vpop.eup %1701 }
 0xed2   : > { %1021 = vrot.lane.b32.xlu0 %v1702_v18, %s1736_s26 }
 0xed3   : > { %v1704_v2 = vpop.eup %1703 }
 0xed4   : > { %v1015_v1 = vadd.f32 1.0, %v1704_v2 }
 0xed6   : > { %1705 = vrcp.f32 %v1015_v1 }
 0xee0   : > { %v1706_v19 = vpop.eup %1705 }
 0xee1   : > { %v1019_v22 = vmul.f32 %v1706_v19, %v922_v8 }
 0xf44   : > { %v1022_v20 = vpop.permute.xlu0 %1021 }
 0xf45   : > { %v1024_v21 = vmul.f32 %v1706_v19, %v1022_v20 }
 0xf47   : > { %1026 = vrot.lane.b32.xlu1 %v1024_v21, %s1737_s27 }
 0xfb9   : > { %v1027_v23 = vpop.permute.xlu1 %1026 }
 0xfba   : > { %v1029_v24 = vadd.f32 %v1027_v23, %v1019_v22 }
 0xfbc   : > { %1707 = vtanh.f32 %v1029_v24 }
 0xfc6   : > { %v1708_v25 = vpop.eup %1707 }
 0xfc7   : > { %1032 = vrot.lane.b32.xlu0 %v1708_v25, %s1736_s26 }
0x1039   : > { %v1033_v26 = vpop.permute.xlu0 %1032 }
0x103a   : > { %v1035_v27 = vmul.f32 %v1706_v19, %v1033_v26 }
0x103c   : > { %1037 = vrot.lane.b32.xlu1 %v1035_v27, %s1737_s27 }
0x10ae   : > { %v1038_v28 = vpop.permute.xlu1 %1037 }
0x10af   : > { %1041 = vst.msk [vmem:[%s1040_s29] sm:$0xff] %vm402_vm2, %v1038_v28  ;;  %1571 = vmatmul.mubr.msk.f32.vlgmr.msra.gmra.mrb[8].mxu1 %vm402_vm2, %v1038_v28 }
0x1182   : > { %v1114_v30 = vpop.f32.mrb[8].mxu1 }
0x1183   : > { %v1118_v31 = vadd.f32 %v1114_v30, %v1045_v29  ;;  %v1572_v32 = vpop.f32.mrb[9].mxu1 }
0x1185   : > { %1709 = vtanh.f32 %v1118_v31  ;;  %v1403_v34 = vmul.f32 -1.442695, %v1118_v31 }
0x1187   : > { %1711 = vpow2.f32 %v1403_v34 }
0x118f   : > { %v1710_v33 = vpop.eup %1709 }
0x1190   : > { %1128 = vrot.lane.b32.xlu0 %v1710_v33, %s1736_s26 }
0x1191   : > { %v1712_v35 = vpop.eup %1711 }
0x1192   : > { %v1122_v36 = vadd.f32 1.0, %v1712_v35 }
0x1194   : > { %1713 = vrcp.f32 %v1122_v36 }
0x119e   : > { %v1714_v37 = vpop.eup %1713 }
0x119f   : > { %v1126_v40 = vmul.f32 %v1714_v37, %v1029_v24 }
0x1202   : > { %v1129_v38 = vpop.permute.xlu0 %1128 }
0x1203   : > { %v1131_v39 = vmul.f32 %v1714_v37, %v1129_v38 }
0x1205   : > { %1133 = vrot.lane.b32.xlu1 %v1131_v39, %s1737_s27 }
0x1277   : > { %v1134_v41 = vpop.permute.xlu1 %1133 }
0x1278   : > { %v1136_v42 = vadd.f32 %v1134_v41, %v1126_v40 }
0x127a   : > { %1715 = vtanh.f32 %v1136_v42 }
0x1284   : > { %v1716_v43 = vpop.eup %1715 }
0x1285   : > { %1139 = vrot.lane.b32.xlu0 %v1716_v43, %s1736_s26 }
0x12f7   : > { %v1140_v44 = vpop.permute.xlu0 %1139 }
0x12f8   : > { %v1142_v45 = vmul.f32 %v1714_v37, %v1140_v44 }
0x12fa   : > { %1144 = vrot.lane.b32.xlu1 %v1142_v45, %s1737_s27 }
0x136c   : > { %v1145_v46 = vpop.permute.xlu1 %1144 }
0x136d   : > { %1148 = vst.msk [vmem:[%s1147_s6] sm:$0xff] %vm402_vm2, %v1145_v46  ;;  %1582 = vmatmul.mubr.msk.f32.vlgmr.msra.gmra.mrb[12].mxu0 %vm402_vm2, %v1145_v46 }
0x1440   : > { %v1221_v48 = vpop.f32.mrb[12].mxu0 }
0x1441   : > { %v1225_v49 = vadd.f32 %v1221_v48, %v1152_v47  ;;  %v1583_v50 = vpop.f32.mrb[13].mxu0 }
0x1443   : > { %1717 = vtanh.f32 %v1225_v49  ;;  %v1406_v52 = vmul.f32 -1.442695, %v1225_v49 }
0x1445   : > { %1719 = vpow2.f32 %v1406_v52 }
0x144d   : > { %v1718_v51 = vpop.eup %1717 }
0x144e   : > { %1235 = vrot.lane.b32.xlu0 %v1718_v51, %s1736_s26 }
0x144f   : > { %v1720_v53 = vpop.eup %1719 }
0x1450   : > { %v1229_v54 = vadd.f32 1.0, %v1720_v53 }
0x1452   : > { %1721 = vrcp.f32 %v1229_v54 }
0x145c   : > { %v1722_v55 = vpop.eup %1721 }
0x145d   : > { %v1233_v58 = vmul.f32 %v1722_v55, %v1136_v42 }
0x14c0   : > { %v1236_v56 = vpop.permute.xlu0 %1235 }
0x14c1   : > { %v1238_v57 = vmul.f32 %v1722_v55, %v1236_v56 }
0x14c3   : > { %1240 = vrot.lane.b32.xlu1 %v1238_v57, %s1737_s27 }
0x1535   : > { %v1241_v59 = vpop.permute.xlu1 %1240 }
0x1536   : > { %v1243_v60 = vadd.f32 %v1241_v59, %v1233_v58 }
0x1538   : > { %1723 = vtanh.f32 %v1243_v60 }
0x1542   : > { %v1724_v61 = vpop.eup %1723 }
0x1543   : > { %1246 = vrot.lane.b32.xlu0 %v1724_v61, %s1736_s26 }
0x15b5   : > { %v1247_v62 = vpop.permute.xlu0 %1246 }
0x15b6   : > { %v1249_v63 = vmul.f32 %v1722_v55, %v1247_v62 }
0x15b8   : > { %1251 = vrot.lane.b32.xlu1 %v1249_v63, %s1737_s27 }
0x162a   : > { %v1252_v0 = vpop.permute.xlu1 %1251 }
0x162b   : > { %1255 = vst.msk [vmem:[%s1254_s16] sm:$0xff] %vm402_vm2, %v1252_v0 }
0x162c PF: > { %s14_s15 = sadd.s32 1, %s1731_s15  }
0x162d   : > { %p11_p5 = scmp.ge.s32.totalorder %s14_s15, 4  }
0x162f   :  { %13 = sbr.rel (!%p11_p5) target bundleno = 1 (0x1), region = 88 }

</bundles_post_ra>
